<compile_context>
chip_gen: v5e
topology: v5e:2x2
jax: 0.10.0
libtpu: 0.0.40
codegen_flags: <defaults>
</compile_context>

<pallas_src>
import jax
import jax.numpy as jnp
from jax.experimental import pallas as pl
from jax.experimental.pallas import tpu as pltpu


def _round_up(a, n):
    return -(-a // n) * n


# ----------------------------------------------------------------------------
# Pallas kernels
# ----------------------------------------------------------------------------
def _conv_relu_pool_kernel(cols_ref, w_ref, b_ref, o_ref):
    # cols: (Kp, 4*tm)  -- 4 pooling-quadrant column groups, lane-concatenated
    # w:    (Cp, Kp)    b: (Cp, 1)    o: (Cp, tm)
    # One MXU dot (weights pushed once), then the 2x2 max-pool as 3 VPU maxima
    # over 128-aligned lane slices, then bias + ReLU.
    tm = o_ref.shape[-1]
    y = jnp.dot(w_ref[...], cols_ref[...], preferred_element_type=jnp.float32)
    m01 = jnp.maximum(y[:, 0 * tm:1 * tm], y[:, 1 * tm:2 * tm])
    m23 = jnp.maximum(y[:, 2 * tm:3 * tm], y[:, 3 * tm:4 * tm])
    # bias is quadrant-invariant and ReLU is monotone, so
    # relu(max_q(conv_q) + b) == maxpool2x2(relu(conv + b)).
    o_ref[...] = jnp.maximum(jnp.maximum(m01, m23) + b_ref[...], 0.0)


def _fc_head_kernel(x_ref, w1_ref, b1_ref, w2_ref, b2_ref, w3_ref, b3_ref, o_ref):
    # Fused fc1+ReLU -> fc2+ReLU -> fc3, feature-major: activations are (F, TB)
    # with the batch tile on the lane axis; all weights stay VMEM-resident.
    h = jnp.dot(w1_ref[...], x_ref[...], preferred_element_type=jnp.float32) + b1_ref[...]
    h = jnp.maximum(h, 0.0)
    h = jnp.dot(w2_ref[...], h, preferred_element_type=jnp.float32) + b2_ref[...]
    h = jnp.maximum(h, 0.0)
    o_ref[...] = jnp.dot(w3_ref[...], h, preferred_element_type=jnp.float32) + b3_ref[...]


# ----------------------------------------------------------------------------
# Glue: quadrant-grouped im2col (channel-major, batch-minor layout)
# ----------------------------------------------------------------------------
def _im2col_pooled(x, k, pad):
    """x: (Cin, H, W, B) -> cols (4, Cin*k*k, Ph*Pw*B) for conv->ReLU->pool.

    Rows ordered (ci, kh, kw) to match w.reshape(Cout, Cin*k*k); columns
    ordered (ph, pw, b); leading axis is the 2x2 pooling quadrant.
    """
    Cin, H, W, B = x.shape
    if pad:
        x = jnp.pad(x, ((0, 0), (pad, pad), (pad, pad), (0, 0)))
    Hp, Wp = H + 2 * pad, W + 2 * pad
    Ho, Wo = Hp - k + 1, Wp - k + 1
    assert Ho % 2 == 0 and Wo % 2 == 0, "fused 2x2 pool assumes even conv output"
    Ph, Pw = Ho // 2, Wo // 2
    taps = [x[:, kh:kh + Ho, kw:kw + Wo, :] for kh in range(k) for kw in range(k)]
    p = jnp.stack(taps, axis=1)                       # (Cin, k*k, Ho, Wo, B)
    p = p.reshape(Cin * k * k, Ho, Wo, B)             # rows ordered (ci, kh, kw)
    cols = jnp.stack(
        [p[:, dh::2, dw::2, :].reshape(Cin * k * k, Ph * Pw * B)
         for dh in (0, 1) for dw in (0, 1)],
        axis=0)                                       # (4, K, M)
    return cols, Ph, Pw


def _pick_lane_tile(m, rows, row_groups=4, budget_bytes=2 << 20, max_groups=16):
    """Lane tile (multiple of 128) for a (rows, row_groups*tm) f32 input block.

    Caps the per-buffer block at ~budget_bytes (fits the v5e 16 MiB scoped-VMEM
    default and v7x's 64 MiB physical VMEM even double-buffered) and prefers at
    least 2 grid steps so pipelining / v7x's second TensorCore can engage.
    """
    lanes = -(-m // 128)
    cap = max(1, budget_bytes // (rows * row_groups * 4 * 128))
    groups = min(lanes, cap, max_groups)
    if lanes >= 2:
        groups = min(groups, -(-lanes // 2))
    return groups * 128


# ----------------------------------------------------------------------------
# Fused conv + bias + ReLU + 2x2 maxpool
# ----------------------------------------------------------------------------
def conv_relu_pool(x, w, b, pad):
    """x: (Cin, H, W, B); w: (Cout, Cin, k, k); b: (Cout,) -> (Cout, Ph, Pw, B)."""
    Cout, Cin, k, _ = w.shape
    B = x.shape[-1]
    cols, Ph, Pw = _im2col_pooled(x, k, pad)          # (4, K, M)
    K, M = cols.shape[1], cols.shape[2]

    Kp = _round_up(K, 8)
    Cp = _round_up(Cout, 8)
    tm = _pick_lane_tile(M, Kp)
    n_tiles = -(-M // tm)
    Mp = n_tiles * tm

    # Zero-pad, then lay out so each grid step's block holds the 4 quadrants of
    # one lane tile contiguously: (Kp, n_tiles * 4 * tm).
    cols = jnp.pad(cols, ((0, 0), (0, Kp - K), (0, Mp - M)))
    cols = cols.reshape(4, Kp, n_tiles, tm)
    cols = jnp.transpose(cols, (1, 2, 0, 3)).reshape(Kp, n_tiles * 4 * tm)

    w2 = jnp.pad(w.reshape(Cout, K), ((0, Cp - Cout), (0, Kp - K)))
    b2 = jnp.pad(b.reshape(Cout, 1), ((0, Cp - Cout), (0, 0)))

    out = pl.pallas_call(
        _conv_relu_pool_kernel,
        out_shape=jax.ShapeDtypeStruct((Cp, Mp), jnp.float32),
        grid=(n_tiles,),
        in_specs=[
            pl.BlockSpec((Kp, 4 * tm), lambda i: (0, i)),
            pl.BlockSpec((Cp, Kp), lambda i: (0, 0)),
            pl.BlockSpec((Cp, 1), lambda i: (0, 0)),
        ],
        out_specs=pl.BlockSpec((Cp, tm), lambda i: (0, i)),
        compiler_params=pltpu.CompilerParams(
            dimension_semantics=("parallel",)),
    )(cols, w2, b2)
    return out[:Cout, :M].reshape(Cout, Ph, Pw, B)


# ----------------------------------------------------------------------------
# Fused FC head (feature-major, batch on the lane axis, tiled over batch)
# ----------------------------------------------------------------------------
def fc_head(x, params):
    """x: (400, B) feature-major activations -> logits (10, B)."""
    F_in, B = x.shape
    w1, b1 = params["fc1_w"], params["fc1_b"].reshape(-1, 1)   # (120, 400), (120, 1)
    w2, b2 = params["fc2_w"], params["fc2_b"].reshape(-1, 1)   # (84, 120),  (84, 1)
    w3, b3 = params["fc3_w"], params["fc3_b"].reshape(-1, 1)   # (10, 84),   (10, 1)

    n_out = w3.shape[0]
    n_out_p = _round_up(n_out, 8)
    w3p = jnp.pad(w3, ((0, n_out_p - n_out), (0, 0)))
    b3p = jnp.pad(b3, ((0, n_out_p - n_out), (0, 0)))

    tb = _pick_lane_tile(B, F_in, row_groups=1, budget_bytes=1 << 20, max_groups=4)
    n_tiles = -(-B // tb)
    Bp = n_tiles * tb
    xp = jnp.pad(x, ((0, 0), (0, Bp - B)))

    def resident(a):
        shp = a.shape
        return pl.BlockSpec(shp, lambda i, _n=len(shp): (0,) * _n)

    out = pl.pallas_call(
        _fc_head_kernel,
        out_shape=jax.ShapeDtypeStruct((n_out_p, Bp), jnp.float32),
        grid=(n_tiles,),
        in_specs=[pl.BlockSpec((F_in, tb), lambda i: (0, i)),
                  resident(w1), resident(b1),
                  resident(w2), resident(b2),
                  resident(w3p), resident(b3p)],
        out_specs=pl.BlockSpec((n_out_p, tb), lambda i: (0, i)),
        compiler_params=pltpu.CompilerParams(
            dimension_semantics=("parallel",)),
    )(xp, w1, b1, w2, b2, w3p, b3p)
    return out[:n_out, :B]


# ----------------------------------------------------------------------------
# Parameter init (deterministic, synthetic; fc weights stored (out, in) as in torch)
# ----------------------------------------------------------------------------
def init_params(key):
    ks = jax.random.split(key, 10)

    def w_init(k, shape, fan_in):
        return jax.random.normal(k, shape, jnp.float32) * (1.0 / jnp.sqrt(fan_in))

    return {
        "conv1_w": w_init(ks[0], (6, 1, 5, 5), 1 * 5 * 5),
        "conv1_b": w_init(ks[1], (6,), 1 * 5 * 5),
        "conv2_w": w_init(ks[2], (16, 6, 5, 5), 6 * 5 * 5),
        "conv2_b": w_init(ks[3], (16,), 6 * 5 * 5),
        "fc1_w": w_init(ks[4], (120, 400), 400),
        "fc1_b": w_init(ks[5], (120,), 400),
        "fc2_w": w_init(ks[6], (84, 120), 120),
        "fc2_b": w_init(ks[7], (84,), 120),
        "fc3_w": w_init(ks[8], (10, 84), 84),
        "fc3_b": w_init(ks[9], (10,), 84),
    }


# ----------------------------------------------------------------------------
# Forward pass (mirrors ConvNet.forward)
# ----------------------------------------------------------------------------
@jax.jit
def convnet_forward(params, x):
    # x: (B, 1, 28, 28) NCHW float32, as in the PyTorch module.
    xc = jnp.transpose(x, (1, 2, 3, 0))                                    # (1, 28, 28, B)
    h = conv_relu_pool(xc, params["conv1_w"], params["conv1_b"], pad=2)    # (6, 14, 14, B)
    h = conv_relu_pool(h, params["conv2_w"], params["conv2_b"], pad=0)     # (16, 5, 5, B)
    flat = h.reshape(16 * 5 * 5, -1)                                       # (400, B), (c,h,w) row order
    logits = fc_head(flat, params)                                         # (10, B)
    return logits.T                                                        # (B, 10)


# ----------------------------------------------------------------------------
# Plain-JAX reference (numerical sanity check)
# ----------------------------------------------------------------------------
def reference_forward(params, x):
    dn = ("NCHW", "OIHW", "NCHW")
    hp = jax.lax.Precision.HIGHEST
    y = jax.lax.conv_general_dilated(x, params["conv1_w"], (1, 1), ((2, 2), (2, 2)),
                                     dimension_numbers=dn, precision=hp)
    y = jax.nn.relu(y + params["conv1_b"][None, :, None, None])
    y = jax.lax.reduce_window(y, -jnp.inf, jax.lax.max, (1, 1, 2, 2), (1, 1, 2, 2), "VALID")
    y = jax.lax.conv_general_dilated(y, params["conv2_w"], (1, 1), "VALID",
                                     dimension_numbers=dn, precision=hp)
    y = jax.nn.relu(y + params["conv2_b"][None, :, None, None])
    y = jax.lax.reduce_window(y, -jnp.inf, jax.lax.max, (1, 1, 2, 2), (1, 1, 2, 2), "VALID")
    y = y.reshape(-1, 16 * 5 * 5)
    y = jax.nn.relu(jnp.dot(y, params["fc1_w"].T, precision=hp) + params["fc1_b"])
    y = jax.nn.relu(jnp.dot(y, params["fc2_w"].T, precision=hp) + params["fc2_b"])
    return jnp.dot(y, params["fc3_w"].T, precision=hp) + params["fc3_b"]


if __name__ == "__main__":
    key = jax.random.PRNGKey(0)
    k_param, k_x = jax.random.split(key)
    params = init_params(k_param)
    # LeNet-style input: batch=2, 1 channel, 28x28 (required by the 16*5*5 flatten).
    x = jax.random.normal(k_x, (2, 1, 28, 28), jnp.float32)

    out = jax.block_until_ready(convnet_forward(params, x))
    assert out.shape == (2, 10), f"bad output shape {out.shape}"

    ref = reference_forward(params, x)
    max_err = float(jnp.max(jnp.abs(out - ref)))
    assert max_err < 5e-2, f"mismatch vs reference: max abs err {max_err}"

    print("KERNEL_OK")
</pallas_src>

<mosaic_0001>
module attributes {stable_mosaic.version = 11 : i64} {
  func.func @_conv_relu_pool_kernel(%arg0: i32, %arg1: memref<32x1024xf32, #tpu.memory_space<vmem>>, %arg2: memref<8x32xf32, #tpu.memory_space<vmem>>, %arg3: memref<8x1xf32, #tpu.memory_space<vmem>>, %arg4: memref<8x256xf32, #tpu.memory_space<vmem>>) attributes {dimension_semantics = [#tpu.dimension_semantics<parallel>], iteration_bounds = array<i64: 2>, scalar_prefetch = 0 : i64, scratch_operands = 0 : i64, tpu.core_type = #tpu.core_type<tc>, window_params = [{transform_indices = @transform_0, window_bounds = array<i64: 32, 1024>}, {pipeline_mode = #tpu.pipeline_mode<synchronous>, transform_indices = @transform_1, window_bounds = array<i64: 8, 32>}, {pipeline_mode = #tpu.pipeline_mode<synchronous>, transform_indices = @transform_2, window_bounds = array<i64: 8, 1>}, {transform_indices = @transform_3, window_bounds = array<i64: 8, 256>}]} {
    %c0 = arith.constant 0 : index
    %c0_0 = arith.constant 0 : index
    %0 = vector.load %arg2[%c0, %c0_0] : memref<8x32xf32, #tpu.memory_space<vmem>>, vector<8x32xf32>
    %c0_1 = arith.constant 0 : index
    %c0_2 = arith.constant 0 : index
    %1 = vector.load %arg1[%c0_1, %c0_2] : memref<32x1024xf32, #tpu.memory_space<vmem>>, vector<32x1024xf32>
    %cst = arith.constant dense<0.000000e+00> : vector<8x1024xf32>
    %2 = tpu.matmul %0, %1, %cst {dimension_numbers = #tpu.dot_dimension_numbers<[1], [0], [0], [1], [0, 0, 1, 1], [], []>} : vector<8x32xf32>, vector<32x1024xf32>, vector<8x1024xf32> -> vector<8x1024xf32>
    %3 = vector.extract_strided_slice %2 {offsets = [0, 0], sizes = [8, 256], strides = [1, 1]} : vector<8x1024xf32> to vector<8x256xf32>
    %4 = vector.extract_strided_slice %2 {offsets = [0, 256], sizes = [8, 256], strides = [1, 1]} : vector<8x1024xf32> to vector<8x256xf32>
    %5 = arith.maximumf %3, %4 : vector<8x256xf32>
    %6 = vector.extract_strided_slice %2 {offsets = [0, 512], sizes = [8, 256], strides = [1, 1]} : vector<8x1024xf32> to vector<8x256xf32>
    %7 = vector.extract_strided_slice %2 {offsets = [0, 768], sizes = [8, 256], strides = [1, 1]} : vector<8x1024xf32> to vector<8x256xf32>
    %8 = arith.maximumf %6, %7 : vector<8x256xf32>
    %9 = arith.maximumf %5, %8 : vector<8x256xf32>
    %c0_3 = arith.constant 0 : index
    %c0_4 = arith.constant 0 : index
    %10 = vector.load %arg3[%c0_3, %c0_4] : memref<8x1xf32, #tpu.memory_space<vmem>>, vector<8x1xf32>
    %11 = vector.broadcast %10 : vector<8x1xf32> to vector<8x256xf32>
    %12 = arith.addf %9, %11 : vector<8x256xf32>
    %cst_5 = arith.constant 0.000000e+00 : f32
    %13 = vector.broadcast %cst_5 : f32 to vector<8x256xf32>
    %14 = arith.maximumf %12, %13 : vector<8x256xf32>
    %c0_6 = arith.constant 0 : index
    %c0_7 = arith.constant 0 : index
    %15 = vector.load %arg4[%c0_6, %c0_7] : memref<8x256xf32, #tpu.memory_space<vmem>>, vector<8x256xf32>
    tpu.vector_store %arg4[%c0_6, %c0_7], %14 {strides = array<i32>} : memref<8x256xf32, #tpu.memory_space<vmem>>, vector<8x256xf32>,
    return
  }
  func.func @transform_0(%arg0: i32) -> (i32, i32) {
    %c0_i32 = arith.constant 0 : i32
    %c0_i32_0 = arith.constant 0 : i32
    return %c0_i32, %arg0 : i32, i32
  }
  func.func @transform_1(%arg0: i32) -> (i32, i32) {
    %c0_i32 = arith.constant 0 : i32
    %c0_i32_0 = arith.constant 0 : i32
    %c0_i32_1 = arith.constant 0 : i32
    return %c0_i32, %c0_i32_0 : i32, i32
  }
  func.func @transform_2(%arg0: i32) -> (i32, i32) {
    %c0_i32 = arith.constant 0 : i32
    %c0_i32_0 = arith.constant 0 : i32
    %c0_i32_1 = arith.constant 0 : i32
    return %c0_i32, %c0_i32_0 : i32, i32
  }
  func.func @transform_3(%arg0: i32) -> (i32, i32) {
    %c0_i32 = arith.constant 0 : i32
    %c0_i32_0 = arith.constant 0 : i32
    return %c0_i32, %arg0 : i32, i32
  }
}

module attributes {stable_mosaic.version = 11 : i64} {
  func.func @_conv_relu_pool_kernel(%arg0: i32, %arg1: memref<152x512xf32, #tpu.memory_space<vmem>>, %arg2: memref<16x152xf32, #tpu.memory_space<vmem>>, %arg3: memref<16x1xf32, #tpu.memory_space<vmem>>, %arg4: memref<16x128xf32, #tpu.memory_space<vmem>>) attributes {dimension_semantics = [#tpu.dimension_semantics<parallel>], iteration_bounds = array<i64: 1>, scalar_prefetch = 0 : i64, scratch_operands = 0 : i64, tpu.core_type = #tpu.core_type<tc>, window_params = [{transform_indices = @transform_0, window_bounds = array<i64: 152, 512>}, {pipeline_mode = #tpu.pipeline_mode<synchronous>, transform_indices = @transform_1, window_bounds = array<i64: 16, 152>}, {pipeline_mode = #tpu.pipeline_mode<synchronous>, transform_indices = @transform_2, window_bounds = array<i64: 16, 1>}, {transform_indices = @transform_3, window_bounds = array<i64: 16, 128>}]} {
    %c0 = arith.constant 0 : index
    %c0_0 = arith.constant 0 : index
    %0 = vector.load %arg2[%c0, %c0_0] : memref<16x152xf32, #tpu.memory_space<vmem>>, vector<16x152xf32>
    %c0_1 = arith.constant 0 : index
    %c0_2 = arith.constant 0 : index
    %1 = vector.load %arg1[%c0_1, %c0_2] : memref<152x512xf32, #tpu.memory_space<vmem>>, vector<152x512xf32>
    %cst = arith.constant dense<0.000000e+00> : vector<16x512xf32>
    %2 = tpu.matmul %0, %1, %cst {dimension_numbers = #tpu.dot_dimension_numbers<[1], [0], [0], [1], [0, 0, 1, 1], [], []>} : vector<16x152xf32>, vector<152x512xf32>, vector<16x512xf32> -> vector<16x512xf32>
    %3 = vector.extract_strided_slice %2 {offsets = [0, 0], sizes = [16, 128], strides = [1, 1]} : vector<16x512xf32> to vector<16x128xf32>
    %4 = vector.extract_strided_slice %2 {offsets = [0, 128], sizes = [16, 128], strides = [1, 1]} : vector<16x512xf32> to vector<16x128xf32>
    %5 = arith.maximumf %3, %4 : vector<16x128xf32>
    %6 = vector.extract_strided_slice %2 {offsets = [0, 256], sizes = [16, 128], strides = [1, 1]} : vector<16x512xf32> to vector<16x128xf32>
    %7 = vector.extract_strided_slice %2 {offsets = [0, 384], sizes = [16, 128], strides = [1, 1]} : vector<16x512xf32> to vector<16x128xf32>
    %8 = arith.maximumf %6, %7 : vector<16x128xf32>
    %9 = arith.maximumf %5, %8 : vector<16x128xf32>
    %c0_3 = arith.constant 0 : index
    %c0_4 = arith.constant 0 : index
    %10 = vector.load %arg3[%c0_3, %c0_4] : memref<16x1xf32, #tpu.memory_space<vmem>>, vector<16x1xf32>
    %11 = vector.broadcast %10 : vector<16x1xf32> to vector<16x128xf32>
    %12 = arith.addf %9, %11 : vector<16x128xf32>
    %cst_5 = arith.constant 0.000000e+00 : f32
    %13 = vector.broadcast %cst_5 : f32 to vector<16x128xf32>
    %14 = arith.maximumf %12, %13 : vector<16x128xf32>
    %c0_6 = arith.constant 0 : index
    %c0_7 = arith.constant 0 : index
    %15 = vector.load %arg4[%c0_6, %c0_7] : memref<16x128xf32, #tpu.memory_space<vmem>>, vector<16x128xf32>
    tpu.vector_store %arg4[%c0_6, %c0_7], %14 {strides = array<i32>} : memref<16x128xf32, #tpu.memory_space<vmem>>, vector<16x128xf32>,
    return
  }
  func.func @transform_0(%arg0: i32) -> (i32, i32) {
    %c0_i32 = arith.constant 0 : i32
    %c0_i32_0 = arith.constant 0 : i32
    return %c0_i32, %arg0 : i32, i32
  }
  func.func @transform_1(%arg0: i32) -> (i32, i32) {
    %c0_i32 = arith.constant 0 : i32
    %c0_i32_0 = arith.constant 0 : i32
    %c0_i32_1 = arith.constant 0 : i32
    return %c0_i32, %c0_i32_0 : i32, i32
  }
  func.func @transform_2(%arg0: i32) -> (i32, i32) {
    %c0_i32 = arith.constant 0 : i32
    %c0_i32_0 = arith.constant 0 : i32
    %c0_i32_1 = arith.constant 0 : i32
    return %c0_i32, %c0_i32_0 : i32, i32
  }
  func.func @transform_3(%arg0: i32) -> (i32, i32) {
    %c0_i32 = arith.constant 0 : i32
    %c0_i32_0 = arith.constant 0 : i32
    return %c0_i32, %arg0 : i32, i32
  }
}

module attributes {stable_mosaic.version = 11 : i64} {
  func.func @_fc_head_kernel(%arg0: i32, %arg1: memref<400x128xf32, #tpu.memory_space<vmem>>, %arg2: memref<120x400xf32, #tpu.memory_space<vmem>>, %arg3: memref<120x1xf32, #tpu.memory_space<vmem>>, %arg4: memref<84x120xf32, #tpu.memory_space<vmem>>, %arg5: memref<84x1xf32, #tpu.memory_space<vmem>>, %arg6: memref<16x84xf32, #tpu.memory_space<vmem>>, %arg7: memref<16x1xf32, #tpu.memory_space<vmem>>, %arg8: memref<16x128xf32, #tpu.memory_space<vmem>>) attributes {dimension_semantics = [#tpu.dimension_semantics<parallel>], iteration_bounds = array<i64: 1>, scalar_prefetch = 0 : i64, scratch_operands = 0 : i64, tpu.core_type = #tpu.core_type<tc>, window_params = [{transform_indices = @transform_0, window_bounds = array<i64: 400, 128>}, {pipeline_mode = #tpu.pipeline_mode<synchronous>, transform_indices = @transform_1, window_bounds = array<i64: 120, 400>}, {pipeline_mode = #tpu.pipeline_mode<synchronous>, transform_indices = @transform_2, window_bounds = array<i64: 120, 1>}, {pipeline_mode = #tpu.pipeline_mode<synchronous>, transform_indices = @transform_3, window_bounds = array<i64: 84, 120>}, {pipeline_mode = #tpu.pipeline_mode<synchronous>, transform_indices = @transform_4, window_bounds = array<i64: 84, 1>}, {pipeline_mode = #tpu.pipeline_mode<synchronous>, transform_indices = @transform_5, window_bounds = array<i64: 16, 84>}, {pipeline_mode = #tpu.pipeline_mode<synchronous>, transform_indices = @transform_6, window_bounds = array<i64: 16, 1>}, {transform_indices = @transform_7, window_bounds = array<i64: 16, 128>}]} {
    %c0 = arith.constant 0 : index
    %c0_0 = arith.constant 0 : index
    %0 = vector.load %arg2[%c0, %c0_0] : memref<120x400xf32, #tpu.memory_space<vmem>>, vector<120x400xf32>
    %c0_1 = arith.constant 0 : index
    %c0_2 = arith.constant 0 : index
    %1 = vector.load %arg1[%c0_1, %c0_2] : memref<400x128xf32, #tpu.memory_space<vmem>>, vector<400x128xf32>
    %cst = arith.constant dense<0.000000e+00> : vector<120x128xf32>
    %2 = tpu.matmul %0, %1, %cst {dimension_numbers = #tpu.dot_dimension_numbers<[1], [0], [0], [1], [0, 0, 1, 1], [], []>} : vector<120x400xf32>, vector<400x128xf32>, vector<120x128xf32> -> vector<120x128xf32>
    %c0_3 = arith.constant 0 : index
    %c0_4 = arith.constant 0 : index
    %3 = vector.load %arg3[%c0_3, %c0_4] : memref<120x1xf32, #tpu.memory_space<vmem>>, vector<120x1xf32>
    %4 = vector.broadcast %3 : vector<120x1xf32> to vector<120x128xf32>
    %5 = arith.addf %2, %4 : vector<120x128xf32>
    %cst_5 = arith.constant 0.000000e+00 : f32
    %6 = vector.broadcast %cst_5 : f32 to vector<120x128xf32>
    %7 = arith.maximumf %5, %6 : vector<120x128xf32>
    %c0_6 = arith.constant 0 : index
    %c0_7 = arith.constant 0 : index
    %8 = vector.load %arg4[%c0_6, %c0_7] : memref<84x120xf32, #tpu.memory_space<vmem>>, vector<84x120xf32>
    %cst_8 = arith.constant dense<0.000000e+00> : vector<84x128xf32>
    %9 = tpu.matmul %8, %7, %cst_8 {dimension_numbers = #tpu.dot_dimension_numbers<[1], [0], [0], [1], [0, 0, 1, 1], [], []>} : vector<84x120xf32>, vector<120x128xf32>, vector<84x128xf32> -> vector<84x128xf32>
    %c0_9 = arith.constant 0 : index
    %c0_10 = arith.constant 0 : index
    %10 = vector.load %arg5[%c0_9, %c0_10] : memref<84x1xf32, #tpu.memory_space<vmem>>, vector<84x1xf32>
    %11 = vector.broadcast %10 : vector<84x1xf32> to vector<84x128xf32>
    %12 = arith.addf %9, %11 : vector<84x128xf32>
    %cst_11 = arith.constant 0.000000e+00 : f32
    %13 = vector.broadcast %cst_11 : f32 to vector<84x128xf32>
    %14 = arith.maximumf %12, %13 : vector<84x128xf32>
    %c0_12 = arith.constant 0 : index
    %c0_13 = arith.constant 0 : index
    %15 = vector.load %arg6[%c0_12, %c0_13] : memref<16x84xf32, #tpu.memory_space<vmem>>, vector<16x84xf32>
    %cst_14 = arith.constant dense<0.000000e+00> : vector<16x128xf32>
    %16 = tpu.matmul %15, %14, %cst_14 {dimension_numbers = #tpu.dot_dimension_numbers<[1], [0], [0], [1], [0, 0, 1, 1], [], []>} : vector<16x84xf32>, vector<84x128xf32>, vector<16x128xf32> -> vector<16x128xf32>
    %c0_15 = arith.constant 0 : index
    %c0_16 = arith.constant 0 : index
    %17 = vector.load %arg7[%c0_15, %c0_16] : memref<16x1xf32, #tpu.memory_space<vmem>>, vector<16x1xf32>
    %18 = vector.broadcast %17 : vector<16x1xf32> to vector<16x128xf32>
    %19 = arith.addf %16, %18 : vector<16x128xf32>
    %c0_17 = arith.constant 0 : index
    %c0_18 = arith.constant 0 : index
    %20 = vector.load %arg8[%c0_17, %c0_18] : memref<16x128xf32, #tpu.memory_space<vmem>>, vector<16x128xf32>
    tpu.vector_store %arg8[%c0_17, %c0_18], %19 {strides = array<i32>} : memref<16x128xf32, #tpu.memory_space<vmem>>, vector<16x128xf32>,
    return
  }
  func.func @transform_0(%arg0: i32) -> (i32, i32) {
    %c0_i32 = arith.constant 0 : i32
    %c0_i32_0 = arith.constant 0 : i32
    return %c0_i32, %arg0 : i32, i32
  }
  func.func @transform_1(%arg0: i32) -> (i32, i32) {
    %c0_i32 = arith.constant 0 : i32
    %c0_i32_0 = arith.constant 0 : i32
    %c0_i32_1 = arith.constant 0 : i32
    return %c0_i32, %c0_i32_0 : i32, i32
  }
  func.func @transform_2(%arg0: i32) -> (i32, i32) {
    %c0_i32 = arith.constant 0 : i32
    %c0_i32_0 = arith.constant 0 : i32
    %c0_i32_1 = arith.constant 0 : i32
    return %c0_i32, %c0_i32_0 : i32, i32
  }
  func.func @transform_3(%arg0: i32) -> (i32, i32) {
    %c0_i32 = arith.constant 0 : i32
    %c0_i32_0 = arith.constant 0 : i32
    %c0_i32_1 = arith.constant 0 : i32
    return %c0_i32, %c0_i32_0 : i32, i32
  }
  func.func @transform_4(%arg0: i32) -> (i32, i32) {
    %c0_i32 = arith.constant 0 : i32
    %c0_i32_0 = arith.constant 0 : i32
    %c0_i32_1 = arith.constant 0 : i32
    return %c0_i32, %c0_i32_0 : i32, i32
  }
  func.func @transform_5(%arg0: i32) -> (i32, i32) {
    %c0_i32 = arith.constant 0 : i32
    %c0_i32_0 = arith.constant 0 : i32
    %c0_i32_1 = arith.constant 0 : i32
    return %c0_i32, %c0_i32_0 : i32, i32
  }
  func.func @transform_6(%arg0: i32) -> (i32, i32) {
    %c0_i32 = arith.constant 0 : i32
    %c0_i32_0 = arith.constant 0 : i32
    %c0_i32_1 = arith.constant 0 : i32
    return %c0_i32, %c0_i32_0 : i32, i32
  }
  func.func @transform_7(%arg0: i32) -> (i32, i32) {
    %c0_i32 = arith.constant 0 : i32
    %c0_i32_0 = arith.constant 0 : i32
    return %c0_i32, %arg0 : i32, i32
  }
}

</mosaic_0001>

<bundles_post_ra>
// kernel: convnet_forward.3
= control target key start
LH: loop header
LB: loop body
LE: loop exit
PB: predicated region body
PF: predicated region fallthrough
CT: control target
= control target key end

     0   :  { %s625_s12 = smov 0   ;;  %s627_s13 = smov 0   ;;  %s793_s0 = inlined_call_operand.vmem [shape: f32[32,2048], index: 0, kind: input, shape index: {}]   ;;  %s794_s1 = inlined_call_operand.vmem [shape: f32[8,32], index: 1, kind: input, shape index: {}]   ;;  %s795_s2 = inlined_call_operand.vmem [shape: f32[8,1], index: 2, kind: input, shape index: {}]   ;;  %s796_s3 = inlined_call_operand.vmem [shape: f32[8,512], index: 3, kind: output, shape index: {}]  }
   0x1   :  { %s629_s14 = smov 0  }
   0x2 LB: > { %s532_s15 = sadd.s32 4294967295, %s602_s14   ;;  %s642_s16 = sadd.s32 1, %s602_s14   ;;  %s602_s14 = sphi %s629_s14, %s799_s14   ;;  %s598_s13 = sphi %s627_s13, %s798_s13   ;;  %s594_s12 = sphi %s625_s12, %s797_s12  }
   0x3   : > { %s17_s17 = ssub.s32 %s602_s14, %s642_s16  ;;  %s20_s18 = sadd.s32 1, %s598_s13 }
   0x4   : > { %p18_p0 = scmp.eq.s32.totalorder %s17_s17, 0  ;;  %p27_p1 = scmp.ne.s32.totalorder %s598_s13, %s594_s12 }
   0x5   : > { %p28_p2 = scmp.eq.s32.totalorder %s602_s14, 0  ;;  %p535_p4 = scmp.ge.s32.totalorder %s602_s14, 2 }
   0x6   : > { %s651_s19 = scalar_select %p18_p0, %s598_s13, %s20_s18  }
   0x7   : > { %p29_p3 = por %p28_p2, %p27_p1  ;;  %127 = sbr.rel (%p535_p4) target bundleno = 48 (0x30), region = 24 }
   0xc   : > { %130 = sbr.rel (!%p29_p3) target bundleno = 48 (0x30), region = 28  ;;  %s132_s20 = sand.u32 (%p29_p3), 1, %s598_s13  }
   0xd   : > { %s553_s21 = sshll.u32 (%p29_p3), %s602_s14, 6  ;;  %s536_s22 = sshll.u32 (%p29_p3), %s132_s20, 8 }
   0xe   : > { %s659_s25 = scalar_lea.vmem (%p29_p3), %s793_s0, %s553_s21  ;;  %s664_s26 = scalar_lea.vmem (%p29_p3), [#allocation2], %s536_s22 }
   0xf   : > { %v150_v0 = vld [vmem:[%s659_s25] sm:$0xff] (%p29_p3)  ;;  %v152_v1 = vld [vmem:[%s659_s25 + $0x8] sm:$0xff] (%p29_p3)  ;;  %v154_v2 = vld [vmem:[%s659_s25 + $0x10] sm:$0xff] (%p29_p3) }
  0x10   : > { %151 = vst [vmem:[%s664_s26] sm:$0xff] (%p29_p3), %v150_v0  ;;  %v156_v3 = vld [vmem:[%s659_s25 + $0x18] sm:$0xff] (%p29_p3)  ;;  %v158_v4 = vld [vmem:[%s659_s25 + $0x20] sm:$0xff] (%p29_p3)  ;;  %v160_v5 = vld [vmem:[%s659_s25 + $0x28] sm:$0xff] (%p29_p3) }
  0x11   : > { %153 = vst [vmem:[%s664_s26 + $0x8] sm:$0xff] %v152_v1  ;;  %v162_v6 = vld [vmem:[%s659_s25 + $0x30] sm:$0xff]  ;;  %v164_v7 = vld [vmem:[%s659_s25 + $0x38] sm:$0xff]  ;;  %v166_v8 = vld [vmem:[%s659_s25 + $0x80] sm:$0xff] }
  0x12   : > { %155 = vst [vmem:[%s664_s26 + $0x10] sm:$0xff] %v154_v2  ;;  %v168_v9 = vld [vmem:[%s659_s25 + $0x88] sm:$0xff]  ;;  %v170_v10 = vld [vmem:[%s659_s25 + $0x90] sm:$0xff]  ;;  %v172_v11 = vld [vmem:[%s659_s25 + $0x98] sm:$0xff] }
  0x13   : > { %157 = vst [vmem:[%s664_s26 + $0x18] sm:$0xff] %v156_v3  ;;  %v174_v12 = vld [vmem:[%s659_s25 + $0xa0] sm:$0xff]  ;;  %v176_v13 = vld [vmem:[%s659_s25 + $0xa8] sm:$0xff]  ;;  %v178_v14 = vld [vmem:[%s659_s25 + $0xb0] sm:$0xff] }
  0x14   : > { %159 = vst [vmem:[%s664_s26 + $0x20] sm:$0xff] %v158_v4  ;;  %v180_v15 = vld [vmem:[%s659_s25 + $0xb8] sm:$0xff]  ;;  %v182_v16 = vld [vmem:[%s659_s25 + $0x100] sm:$0xff]  ;;  %v184_v17 = vld [vmem:[%s659_s25 + $0x108] sm:$0xff] }
  0x15   : > { %161 = vst [vmem:[%s664_s26 + $0x28] sm:$0xff] %v160_v5  ;;  %v186_v18 = vld [vmem:[%s659_s25 + $0x110] sm:$0xff]  ;;  %v188_v19 = vld [vmem:[%s659_s25 + $0x118] sm:$0xff]  ;;  %v190_v20 = vld [vmem:[%s659_s25 + $0x120] sm:$0xff] }
  0x16   : > { %163 = vst [vmem:[%s664_s26 + $0x30] sm:$0xff] %v162_v6  ;;  %v192_v21 = vld [vmem:[%s659_s25 + $0x128] sm:$0xff]  ;;  %v194_v22 = vld [vmem:[%s659_s25 + $0x130] sm:$0xff]  ;;  %v196_v23 = vld [vmem:[%s659_s25 + $0x138] sm:$0xff] }
  0x17   : > { %165 = vst [vmem:[%s664_s26 + $0x38] sm:$0xff] %v164_v7  ;;  %v198_v24 = vld [vmem:[%s659_s25 + $0x180] sm:$0xff]  ;;  %v200_v25 = vld [vmem:[%s659_s25 + $0x188] sm:$0xff]  ;;  %v202_v26 = vld [vmem:[%s659_s25 + $0x190] sm:$0xff] }
  0x18   : > { %167 = vst [vmem:[%s664_s26 + $0x40] sm:$0xff] %v166_v8  ;;  %v204_v27 = vld [vmem:[%s659_s25 + $0x198] sm:$0xff]  ;;  %v206_v28 = vld [vmem:[%s659_s25 + $0x1a0] sm:$0xff]  ;;  %v208_v29 = vld [vmem:[%s659_s25 + $0x1a8] sm:$0xff] }
  0x19   : > { %169 = vst [vmem:[%s664_s26 + $0x48] sm:$0xff] %v168_v9  ;;  %v210_v30 = vld [vmem:[%s659_s25 + $0x1b0] sm:$0xff]  ;;  %v212_v31 = vld [vmem:[%s659_s25 + $0x1b8] sm:$0xff] }
  0x1a   : > { %171 = vst [vmem:[%s664_s26 + $0x50] sm:$0xff] %v170_v10 }
  0x1b   : > { %173 = vst [vmem:[%s664_s26 + $0x58] sm:$0xff] %v172_v11 }
  0x1c   : > { %175 = vst [vmem:[%s664_s26 + $0x60] sm:$0xff] %v174_v12 }
  0x1d   : > { %177 = vst [vmem:[%s664_s26 + $0x68] sm:$0xff] %v176_v13 }
  0x1e   : > { %179 = vst [vmem:[%s664_s26 + $0x70] sm:$0xff] %v178_v14 }
  0x1f   : > { %181 = vst [vmem:[%s664_s26 + $0x78] sm:$0xff] %v180_v15 }
  0x20   : > { %183 = vst [vmem:[%s664_s26 + $0x80] sm:$0xff] %v182_v16 }
  0x21   : > { %185 = vst [vmem:[%s664_s26 + $0x88] sm:$0xff] %v184_v17 }
  0x22   : > { %187 = vst [vmem:[%s664_s26 + $0x90] sm:$0xff] %v186_v18 }
  0x23   : > { %189 = vst [vmem:[%s664_s26 + $0x98] sm:$0xff] %v188_v19 }
  0x24   : > { %191 = vst [vmem:[%s664_s26 + $0xa0] sm:$0xff] %v190_v20 }
  0x25   : > { %193 = vst [vmem:[%s664_s26 + $0xa8] sm:$0xff] %v192_v21 }
  0x26   : > { %195 = vst [vmem:[%s664_s26 + $0xb0] sm:$0xff] %v194_v22 }
  0x27   : > { %197 = vst [vmem:[%s664_s26 + $0xb8] sm:$0xff] %v196_v23 }
  0x28   : > { %199 = vst [vmem:[%s664_s26 + $0xc0] sm:$0xff] %v198_v24 }
  0x29   : > { %201 = vst [vmem:[%s664_s26 + $0xc8] sm:$0xff] %v200_v25 }
  0x2a   : > { %203 = vst [vmem:[%s664_s26 + $0xd0] sm:$0xff] %v202_v26 }
  0x2b   : > { %205 = vst [vmem:[%s664_s26 + $0xd8] sm:$0xff] %v204_v27 }
  0x2c   : > { %207 = vst [vmem:[%s664_s26 + $0xe0] sm:$0xff] %v206_v28 }
  0x2d   : > { %209 = vst [vmem:[%s664_s26 + $0xe8] sm:$0xff] %v208_v29 }
  0x2e   : > { %211 = vst [vmem:[%s664_s26 + $0xf0] sm:$0xff] %v210_v30 }
  0x2f   : > { %213 = vst [vmem:[%s664_s26 + $0xf8] sm:$0xff] %v212_v31 }
  0x30 PF: > { %p539_p5 = scmp.ge.s32.totalorder %s602_s14, 1  ;;  %p218_p6 = scmp.lt.s32.totalorder %s602_s14, 3 }
  0x32   : > { %p219_p7 = pnand %p539_p5, %p218_p6 }
  0x33   : > { %s225_s27 = sand.u32 (!%p219_p7), 1, %s594_s12   ;;  %s541_s7 = sshll.u32 (!%p219_p7), %s532_s15, 1 }
  0x34   : > { %222 = sbr.rel (%p219_p7) target bundleno = 216 (0xd8), region = 51  ;;  %s540_s30 = sshll.u32 (!%p219_p7), %s225_s27, 8 }
  0x35   : > { %s733_s4 = scalar_lea.vmem (!%p219_p7), [#allocation2], %s540_s30  ;;  %p250_p8 = scmp.lt.s32.totalorder (!%p219_p7), %s541_s7, 3 }
  0x39   : > { %v458_v32 = vld [vmem:[%s795_s2] sm:$0xff]  ;;  %v604_v33 = vmov 0   ;;  %v282_v34 = vld [vmem:[%s733_s4 + $0xd0] sm:$0xff]  ;;  %v283_v35 = vld [vmem:[%s733_s4 + $0xd8] sm:$0xff]  ;;  %vm288_vm0 = vcmask 261120   ;;  %s801_s7 = smov (!%p250_p8, %s541_s7), 3 }
  0x3a   : > { %579 = vset.pattern.permute.xlu0 %v604_v33  ;;  %v274_v36 = vld [vmem:[%s733_s4 + $0x90] sm:$0xff]  ;;  %344 = vmatpush.msra.mxu2 %v282_v34  ;;  %v275_v37 = vld [vmem:[%s733_s4 + $0x98] sm:$0xff]  ;;  %v280_v40 = vld [vmem:[%s733_s4 + $0xc0] sm:$0xff]  ;;  %s542_s8 = sshll.u32 %s801_s7, 3 }
  0x3b   : > { %461 = vperm.xlu0 %579, %v458_v32   ;;  %364 = vmatpush.msra.mxu3 %v283_v35  ;;  %v266_v38 = vld [vmem:[%s733_s4 + $0x50] sm:$0xff]  ;;  %v267_v39 = vld [vmem:[%s733_s4 + $0x58] sm:$0xff]  ;;  %v281_v41 = vld [vmem:[%s733_s4 + $0xc8] sm:$0xff]  ;;  %s253_s11 = scalar_lea.vmem %s796_s3, %s542_s8 }
  0x3c   : > { %345 = vmatpush.msra.mxu2 %v274_v36  ;;  %v272_v42 = vld [vmem:[%s733_s4 + $0x80] sm:$0xff]  ;;  %304 = vmatpush.msra.mxu0 %v280_v40  ;;  %v258_v43 = vld [vmem:[%s733_s4 + $0x10] sm:$0xff]  ;;  %v259_v44 = vld [vmem:[%s733_s4 + $0x18] sm:$0xff] }
  0x3d   : > { %365 = vmatpush.msra.mxu3 %v275_v37  ;;  %324 = vmatpush.msra.mxu1 %v281_v41  ;;  %v273_v45 = vld [vmem:[%s733_s4 + $0x88] sm:$0xff]  ;;  %v255_v46 = vld [vmem:[%s794_s1] sm:$0xff]  ;;  %v286_v47 = vld [vmem:[%s733_s4 + $0xf0] sm:$0xff] }
  0x3e   : > { %346 = vmatpush.msra.mxu2 %v266_v38  ;;  %305 = vmatpush.msra.mxu0 %v272_v42  ;;  %v287_v48 = vld [vmem:[%s733_s4 + $0xf8] sm:$0xff]  ;;  %v264_v49 = vld [vmem:[%s733_s4 + $0x40] sm:$0xff]  ;;  %v265_v50 = vld [vmem:[%s733_s4 + $0x48] sm:$0xff] }
  0x3f   : > { %366 = vmatpush.msra.mxu3 %v267_v39  ;;  %325 = vmatpush.msra.mxu1 %v273_v45  ;;  %v278_v51 = vld [vmem:[%s733_s4 + $0xb0] sm:$0xff]  ;;  %v279_v52 = vld [vmem:[%s733_s4 + $0xb8] sm:$0xff]  ;;  %v256_v53 = vld [vmem:[%s733_s4] sm:$0xff] }
  0x40   : > { %347 = vmatpush.msra.mxu2 %v258_v43  ;;  %v257_v54 = vld [vmem:[%s733_s4 + $0x8] sm:$0xff]  ;;  %306 = vmatpush.msra.mxu0 %v264_v49  ;;  %v270_v55 = vld [vmem:[%s733_s4 + $0x70] sm:$0xff]  ;;  %v271_v56 = vld [vmem:[%s733_s4 + $0x78] sm:$0xff] }
  0x41   : > { %367 = vmatpush.msra.mxu3 %v259_v44  ;;  %545 = vmatmul.msk.f32.vlgmr.msra.gmra.mxu2 %vm288_vm0, %v255_v46  ;;  %v284_v57 = vld [vmem:[%s733_s4 + $0xe0] sm:$0xff]  ;;  %v262_v58 = vld [vmem:[%s733_s4 + $0x30] sm:$0xff]  ;;  %v285_v59 = vld [vmem:[%s733_s4 + $0xe8] sm:$0xff] }
  0x42   : > { %546 = vmatmul.msk.f32.vlgmr.msra.gmra.mxu3 %vm288_vm0, %v255_v46  ;;  %424 = vmatpush.msrb.mxu2 %v286_v47  ;;  %v263_v60 = vld [vmem:[%s733_s4 + $0x38] sm:$0xff]  ;;  %v276_v61 = vld [vmem:[%s733_s4 + $0xa0] sm:$0xff]  ;;  %v277_v62 = vld [vmem:[%s733_s4 + $0xa8] sm:$0xff] }
  0x43   : > { %444 = vmatpush.msrb.mxu3 %v287_v48  ;;  %326 = vmatpush.msra.mxu1 %v265_v50  ;;  %v268_v63 = vld [vmem:[%s733_s4 + $0x60] sm:$0xff]  ;;  %v269_v0 = vld [vmem:[%s733_s4 + $0x68] sm:$0xff] }
  0x44   : > { %425 = vmatpush.msrb.mxu2 %v278_v51  ;;  %307 = vmatpush.msra.mxu0 %v256_v53  ;;  %v260_v1 = vld [vmem:[%s733_s4 + $0x20] sm:$0xff]  ;;  %v261_v2 = vld [vmem:[%s733_s4 + $0x28] sm:$0xff] }
  0x45   : > { %445 = vmatpush.msrb.mxu3 %v279_v52  ;;  %327 = vmatpush.msra.mxu1 %v257_v54 }
  0x46   : > { %426 = vmatpush.msrb.mxu2 %v270_v55  ;;  %543 = vmatmul.msk.f32.vlgmr.msra.gmra.mxu0 %vm288_vm0, %v255_v46 }
  0x47   : > { %446 = vmatpush.msrb.mxu3 %v271_v56  ;;  %544 = vmatmul.msk.f32.vlgmr.msra.gmra.mxu1 %vm288_vm0, %v255_v46 }
  0x48   : > { %384 = vmatpush.msrb.mxu0 %v284_v57  ;;  %427 = vmatpush.msrb.mxu2 %v262_v58 }
  0x49   : > { %404 = vmatpush.msrb.mxu1 %v285_v59  ;;  %447 = vmatpush.msrb.mxu3 %v263_v60 }
  0x4a   : > { %385 = vmatpush.msrb.mxu0 %v276_v61  ;;  %549 = vmatmul.msk.f32.vlgmr.msrb.gmra.mxu2 %vm288_vm0, %v255_v46 }
  0x4b   : > { %550 = vmatmul.msk.f32.vlgmr.msrb.gmra.mxu3 %vm288_vm0, %v255_v46  ;;  %405 = vmatpush.msrb.mxu1 %v277_v62 }
  0x4c   : > { %386 = vmatpush.msrb.mxu0 %v268_v63 }
  0x4d   : > { %406 = vmatpush.msrb.mxu1 %v269_v0 }
  0x4e   : > { %387 = vmatpush.msrb.mxu0 %v260_v1 }
  0x4f   : > { %407 = vmatpush.msrb.mxu1 %v261_v2  ;;  %547 = vmatmul.msk.f32.vlgmr.msrb.gmra.mxu0 %vm288_vm0, %v255_v46 }
  0x50   : > { %548 = vmatmul.msk.f32.vlgmr.msrb.gmra.mxu1 %vm288_vm0, %v255_v46 }
  0xad   : > { %v462_v15 = vpop.permute.xlu0 %461 }
  0xc3   : > { %v309_v3 = vpop.f32.mrf.mxu0 }
  0xc4   : > { %v329_v4 = vpop.f32.mrf.mxu1  ;;  %v349_v5 = vpop.f32.mrf.mxu2 }
  0xc5   : > { %v369_v6 = vpop.f32.mrf.mxu3  ;;  %v452_v10 = vmax.f32 %v309_v3, %v349_v5 }
  0xc6   : > { %v453_v13 = vmax.f32 %v329_v4, %v369_v6 }
  0xcc   : > { %v389_v7 = vpop.f32.mrf.mxu0 }
  0xcd   : > { %v409_v8 = vpop.f32.mrf.mxu1  ;;  %v429_v9 = vpop.f32.mrf.mxu2 }
  0xce   : > { %v454_v11 = vmax.f32 %v389_v7, %v429_v9  ;;  %v449_v12 = vpop.f32.mrf.mxu3 }
  0xcf   : > { %v455_v14 = vmax.f32 %v409_v8, %v449_v12 }
  0xd0   : > { %v456_v16 = vmax.f32 %v452_v10, %v454_v11 }
  0xd1   : > { %v457_v17 = vmax.f32 %v453_v13, %v455_v14 }
  0xd2   : > { %v464_v18 = vadd.f32 %v462_v15, %v456_v16 }
  0xd3   : > { %v465_v19 = vadd.f32 %v462_v15, %v457_v17 }
  0xd4   : > { %v466_v20 = vmax.f32 %v464_v18, 0.0 }
  0xd5   : > { %v467_v21 = vmax.f32 %v465_v19, 0.0 }
  0xd6   : > { %468 = vst [vmem:[%s253_s11] sm:$0xff] %v466_v20 }
  0xd7   : > { %469 = vst [vmem:[%s253_s11 + $0x8] sm:$0xff] %v467_v21 }
  0xd8 PF: > { %p10_p9 = scmp.ge.s32.totalorder %s642_s16, 4   ;;  %s797_s12 = smov %s598_s13 }
  0xd9   : > { %s798_s13 = smov %s651_s19  ;;  %s799_s14 = smov %s642_s16 }
  0xda   :  { %12 = sbr.rel (!%p10_p9) target bundleno = 2 (0x2), region = 90 }

// kernel: convnet_forward.4
= control target key start
LH: loop header
LB: loop body
LE: loop exit
PB: predicated region body
PF: predicated region fallthrough
CT: control target
= control target key end

     0   :  { %vm94_vm0 = vcmask 195584   ;;  %s634_s0 = inlined_call_operand.vmem [shape: f32[152,512], index: 0, kind: input, shape index: {}]   ;;  %s635_s1 = inlined_call_operand.vmem [shape: f32[16,152], index: 1, kind: input, shape index: {}]   ;;  %s636_s2 = inlined_call_operand.vmem [shape: f32[16,1], index: 2, kind: input, shape index: {}]   ;;  %s637_s3 = inlined_call_operand.vmem [shape: f32[16,128], index: 3, kind: output, shape index: {}]  }
   0x1   :  { %v78_v0 = vld [vmem:[%s634_s0 + $0x1e0] sm:$0xff]  ;;  %v79_v2 = vld [vmem:[%s634_s0 + $0x1e8] sm:$0xff]  ;;  %v80_v12 = vld [vmem:[%s634_s0 + $0x1f0] sm:$0xff] }
   0x2   :  { %v90_v1 = vld [vmem:[%s634_s0 + $0x240] sm:$0xff]  ;;  %101 = vmatpush.msra.mxu0 %v78_v0  ;;  %v362_v3 = vld [vmem:[%s634_s0 + $0x248] sm:$0xff]  ;;  %147 = vmatpush.msra.mxu2 %v79_v2  ;;  %v92_v13 = vld [vmem:[%s634_s0 + $0x250] sm:$0xff] }
   0x3   :  { %137 = vmatpush.msra.mxu1 %v90_v1  ;;  %v74_v4 = vld [vmem:[%s634_s0 + $0x1c0] sm:$0xff]  ;;  %321 = vmatpush.msra.mxu3 %v362_v3  ;;  %v75_v6 = vld [vmem:[%s634_s0 + $0x1c8] sm:$0xff]  ;;  %v76_v16 = vld [vmem:[%s634_s0 + $0x1d0] sm:$0xff] }
   0x4   :  { %v86_v5 = vld [vmem:[%s634_s0 + $0x220] sm:$0xff]  ;;  %v377_v7 = vld [vmem:[%s634_s0 + $0x228] sm:$0xff]  ;;  %102 = vmatpush.msra.mxu0 %v74_v4  ;;  %148 = vmatpush.msra.mxu2 %v75_v6  ;;  %v88_v17 = vld [vmem:[%s634_s0 + $0x230] sm:$0xff] }
   0x5   :  { %v70_v8 = vld [vmem:[%s634_s0 + $0x1a0] sm:$0xff]  ;;  %138 = vmatpush.msra.mxu1 %v86_v5  ;;  %v71_v10 = vld [vmem:[%s634_s0 + $0x1a8] sm:$0xff]  ;;  %322 = vmatpush.msra.mxu3 %v377_v7  ;;  %v72_v20 = vld [vmem:[%s634_s0 + $0x1b0] sm:$0xff] }
   0x6   :  { %v82_v9 = vld [vmem:[%s634_s0 + $0x200] sm:$0xff]  ;;  %v391_v11 = vld [vmem:[%s634_s0 + $0x208] sm:$0xff]  ;;  %103 = vmatpush.msra.mxu0 %v70_v8  ;;  %149 = vmatpush.msra.mxu2 %v71_v10  ;;  %v84_v21 = vld [vmem:[%s634_s0 + $0x210] sm:$0xff] }
   0x7   :  { %139 = vmatpush.msra.mxu1 %v82_v9  ;;  %v66_v14 = vld [vmem:[%s634_s0 + $0x180] sm:$0xff]  ;;  %v67_v15 = vld [vmem:[%s634_s0 + $0x188] sm:$0xff]  ;;  %323 = vmatpush.msra.mxu3 %v391_v11  ;;  %v434_v24 = vld [vmem:[%s635_s1 + $0x18] sm:$0xff] }
   0x8   :  { %v62_v18 = vld [vmem:[%s634_s0 + $0x160] sm:$0xff]  ;;  %v63_v19 = vld [vmem:[%s634_s0 + $0x168] sm:$0xff]  ;;  %104 = vmatpush.msra.mxu0 %v66_v14  ;;  %150 = vmatpush.msra.mxu2 %v67_v15  ;;  %v68_v25 = vld [vmem:[%s634_s0 + $0x190] sm:$0xff] }
   0x9   :  { %193 = vmatpush.msrb.mxu1 %v80_v12  ;;  %229 = vmatpush.msrb.mxu3 %v92_v13  ;;  %v58_v22 = vld [vmem:[%s634_s0 + $0x140] sm:$0xff]  ;;  %v59_v23 = vld [vmem:[%s634_s0 + $0x148] sm:$0xff]  ;;  %v81_v26 = vld [vmem:[%s634_s0 + $0x1f8] sm:$0xff] }
   0xa   :  { %105 = vmatpush.msra.mxu0 %v62_v18  ;;  %151 = vmatpush.msra.mxu2 %v63_v19  ;;  %v54_v27 = vld [vmem:[%s634_s0 + $0x120] sm:$0xff]  ;;  %v55_v28 = vld [vmem:[%s634_s0 + $0x128] sm:$0xff]  ;;  %v64_v29 = vld [vmem:[%s634_s0 + $0x170] sm:$0xff]  ;;  %v329_v18 = vmov 0  }
   0xb   :  { %194 = vmatpush.msrb.mxu1 %v76_v16  ;;  %230 = vmatpush.msrb.mxu3 %v88_v17  ;;  %v77_v30 = vld [vmem:[%s634_s0 + $0x1d8] sm:$0xff]  ;;  %v50_v31 = vld [vmem:[%s634_s0 + $0x100] sm:$0xff]  ;;  %v51_v32 = vld [vmem:[%s634_s0 + $0x108] sm:$0xff] }
   0xc   :  { %106 = vmatpush.msra.mxu0 %v58_v22  ;;  %152 = vmatpush.msra.mxu2 %v59_v23  ;;  %v60_v33 = vld [vmem:[%s634_s0 + $0x150] sm:$0xff]  ;;  %v73_v34 = vld [vmem:[%s634_s0 + $0x1b8] sm:$0xff]  ;;  %v46_v35 = vld [vmem:[%s634_s0 + $0xe0] sm:$0xff] }
   0xd   :  { %195 = vmatpush.msrb.mxu1 %v72_v20  ;;  %231 = vmatpush.msrb.mxu3 %v84_v21  ;;  %v47_v36 = vld [vmem:[%s634_s0 + $0xe8] sm:$0xff]  ;;  %v56_v37 = vld [vmem:[%s634_s0 + $0x130] sm:$0xff]  ;;  %v69_v38 = vld [vmem:[%s634_s0 + $0x198] sm:$0xff] }
   0xe   :  { %316 = vmatmul.msk.f32.vlgmr.msra.gmra.mxu3 %vm94_vm0, %v434_v24  ;;  %107 = vmatpush.msra.mxu0 %v54_v27  ;;  %v42_v39 = vld [vmem:[%s634_s0 + $0xc0] sm:$0xff]  ;;  %v43_v40 = vld [vmem:[%s634_s0 + $0xc8] sm:$0xff]  ;;  %v52_v41 = vld [vmem:[%s634_s0 + $0x110] sm:$0xff] }
   0xf   :  { %196 = vmatpush.msrb.mxu1 %v68_v25  ;;  %239 = vmatpush.msra.mxu3 %v81_v26  ;;  %v65_v42 = vld [vmem:[%s634_s0 + $0x178] sm:$0xff]  ;;  %v38_v43 = vld [vmem:[%s634_s0 + $0xa0] sm:$0xff]  ;;  %v498_v44 = vld [vmem:[%s635_s1 + $0x8] sm:$0xff] }
  0x10   :  { %153 = vmatpush.msra.mxu2 %v55_v28  ;;  %108 = vmatpush.msra.mxu0 %v50_v31  ;;  %v39_v45 = vld [vmem:[%s634_s0 + $0xa8] sm:$0xff]  ;;  %v61_v46 = vld [vmem:[%s634_s0 + $0x158] sm:$0xff]  ;;  %v48_v47 = vld [vmem:[%s634_s0 + $0xf0] sm:$0xff] }
  0x11   :  { %197 = vmatpush.msrb.mxu1 %v64_v29  ;;  %240 = vmatpush.msra.mxu3 %v77_v30  ;;  %v34_v48 = vld [vmem:[%s634_s0 + $0x80] sm:$0xff]  ;;  %v35_v49 = vld [vmem:[%s634_s0 + $0x88] sm:$0xff]  ;;  %v57_v50 = vld [vmem:[%s634_s0 + $0x138] sm:$0xff] }
  0x12   :  { %154 = vmatpush.msra.mxu2 %v51_v32  ;;  %109 = vmatpush.msra.mxu0 %v46_v35  ;;  %v44_v51 = vld [vmem:[%s634_s0 + $0xd0] sm:$0xff]  ;;  %v30_v52 = vld [vmem:[%s634_s0 + $0x60] sm:$0xff]  ;;  %v31_v53 = vld [vmem:[%s634_s0 + $0x68] sm:$0xff] }
  0x13   :  { %198 = vmatpush.msrb.mxu1 %v60_v33  ;;  %241 = vmatpush.msra.mxu3 %v73_v34  ;;  %v53_v54 = vld [vmem:[%s634_s0 + $0x118] sm:$0xff]  ;;  %v40_v55 = vld [vmem:[%s634_s0 + $0xb0] sm:$0xff]  ;;  %v26_v56 = vld [vmem:[%s634_s0 + $0x40] sm:$0xff] }
  0x14   :  { %155 = vmatpush.msra.mxu2 %v47_v36  ;;  %110 = vmatpush.msra.mxu0 %v42_v39  ;;  %v27_v57 = vld [vmem:[%s634_s0 + $0x48] sm:$0xff]  ;;  %v49_v58 = vld [vmem:[%s634_s0 + $0xf8] sm:$0xff]  ;;  %v36_v59 = vld [vmem:[%s634_s0 + $0x90] sm:$0xff] }
  0x15   :  { %199 = vmatpush.msrb.mxu1 %v56_v37  ;;  %242 = vmatpush.msra.mxu3 %v69_v38  ;;  %v22_v60 = vld [vmem:[%s634_s0 + $0x20] sm:$0xff]  ;;  %v23_v61 = vld [vmem:[%s634_s0 + $0x28] sm:$0xff]  ;;  %v45_v62 = vld [vmem:[%s634_s0 + $0xd8] sm:$0xff] }
  0x16   :  { %156 = vmatpush.msra.mxu2 %v43_v40  ;;  %111 = vmatpush.msra.mxu0 %v38_v43  ;;  %v32_v63 = vld [vmem:[%s634_s0 + $0x70] sm:$0xff]  ;;  %v18_v0 = vld [vmem:[%s634_s0] sm:$0xff]  ;;  %v19_v1 = vld [vmem:[%s634_s0 + $0x8] sm:$0xff] }
  0x17   :  { %200 = vmatpush.msrb.mxu1 %v52_v41  ;;  %243 = vmatpush.msra.mxu3 %v65_v42  ;;  %v41_v2 = vld [vmem:[%s634_s0 + $0xb8] sm:$0xff]  ;;  %v14_v4 = vld [vmem:[%s635_s1] sm:$0xff]  ;;  %v28_v5 = vld [vmem:[%s634_s0 + $0x50] sm:$0xff] }
  0x18   :  { %313 = vmatmul.msk.f32.vlgmr.msra.gmra.mxu1 %vm94_vm0, %v498_v44  ;;  %157 = vmatpush.msra.mxu2 %v39_v45  ;;  %v37_v6 = vld [vmem:[%s634_s0 + $0x98] sm:$0xff]  ;;  %v24_v8 = vld [vmem:[%s634_s0 + $0x30] sm:$0xff]  ;;  %v291_v17 = vld [vmem:[%s636_s2] sm:$0xff] }
  0x19   :  { %244 = vmatpush.msra.mxu3 %v61_v46  ;;  %201 = vmatpush.msrb.mxu1 %v48_v47  ;;  %v33_v9 = vld [vmem:[%s634_s0 + $0x78] sm:$0xff]  ;;  %v20_v10 = vld [vmem:[%s634_s0 + $0x10] sm:$0xff] }
  0x1a   :  { %112 = vmatpush.msra.mxu0 %v34_v48  ;;  %158 = vmatpush.msra.mxu2 %v35_v49  ;;  %v93_v12 = vld [vmem:[%s634_s0 + $0x258] sm:$0xff]  ;;  %v16_v14 = vld [vmem:[%s635_s1 + $0x10] sm:$0xff] }
  0x1b   :  { %245 = vmatpush.msra.mxu3 %v57_v50  ;;  %202 = vmatpush.msrb.mxu1 %v44_v51  ;;  %v29_v13 = vld [vmem:[%s634_s0 + $0x58] sm:$0xff] }
  0x1c   :  { %113 = vmatpush.msra.mxu0 %v30_v52  ;;  %159 = vmatpush.msra.mxu2 %v31_v53  ;;  %v89_v15 = vld [vmem:[%s634_s0 + $0x238] sm:$0xff] }
  0x1d   :  { %246 = vmatpush.msra.mxu3 %v53_v54  ;;  %203 = vmatpush.msrb.mxu1 %v40_v55  ;;  %v85_v16 = vld [vmem:[%s634_s0 + $0x218] sm:$0xff] }
  0x1e   :  { %317 = vmatmul.msk.f32.vlgmr.msrb.gmra.mxu3 %vm94_vm0, %v498_v44  ;;  %114 = vmatpush.msra.mxu0 %v26_v56 }
  0x1f   :  { %160 = vmatpush.msra.mxu2 %v27_v57  ;;  %247 = vmatpush.msra.mxu3 %v49_v58 }
  0x20   :  { %204 = vmatpush.msrb.mxu1 %v36_v59  ;;  %115 = vmatpush.msra.mxu0 %v22_v60 }
  0x21   :  { %314 = vmatmul.msk.f32.gmra.mxu1 %vm94_vm0, %v434_v24  ;;  %161 = vmatpush.msra.mxu2 %v23_v61 }
  0x22   :  { %248 = vmatpush.msra.mxu3 %v45_v62  ;;  %205 = vmatpush.msrb.mxu1 %v32_v63 }
  0x23   :  { %116 = vmatpush.msra.mxu0 %v18_v0  ;;  %162 = vmatpush.msra.mxu2 %v19_v1 }
  0x24   :  { %249 = vmatpush.msra.mxu3 %v41_v2  ;;  %117 = vmatmul.f32.vlgmr.msra.gmra.mxu0 %v14_v4 }
  0x25   :  { %163 = vmatmul.f32.vlgmr.msra.gmra.mxu2 %v14_v4  ;;  %206 = vmatpush.msrb.mxu1 %v28_v5 }
  0x26   :  { %250 = vmatpush.msra.mxu3 %v37_v6  ;;  %183 = vmatpush.msrb.mxu2 %v362_v3  ;;  %v25_v3 = vld [vmem:[%s634_s0 + $0x38] sm:$0xff] }
  0x27   :  { %207 = vmatpush.msrb.mxu1 %v24_v8  ;;  %318 = vmatmul.msk.f32.gmra.mxu3 %vm94_vm0, %v434_v24 }
  0x28   :  { %251 = vmatpush.msra.mxu3 %v33_v9  ;;  %184 = vmatpush.msrb.mxu2 %v377_v7  ;;  %v21_v7 = vld [vmem:[%s634_s0 + $0x18] sm:$0xff] }
  0x29   :  { %208 = vmatpush.msrb.mxu1 %v20_v10  ;;  %275 = vmatpush.msrb.mxu0 %v93_v12 }
  0x2a   :  { %209 = vmatmul.f32.vlgmr.msrb.gmra.mxu1 %v14_v4  ;;  %252 = vmatpush.msra.mxu3 %v29_v13 }
  0x2b   :  { %324 = vmatpush.msra.mxu1 %v93_v12  ;;  %185 = vmatpush.msrb.mxu2 %v391_v11  ;;  %v292_v11 = vld [vmem:[%s636_s2 + $0x8] sm:$0xff] }
  0x2c   :  { %253 = vmatpush.msra.mxu3 %v25_v3  ;;  %120 = vmatmul.f32.gmra.mxu0 %v16_v14 }
  0x2d   :  { %166 = vmatmul.f32.gmra.mxu2 %v16_v14  ;;  %276 = vmatpush.msrb.mxu0 %v89_v15 }
  0x2e   :  { %254 = vmatpush.msra.mxu3 %v21_v7  ;;  %325 = vmatpush.msra.mxu1 %v89_v15 }
  0x2f   :  { %255 = vmatmul.f32.vlgmr.msra.gmra.mxu3 %v14_v4  ;;  %277 = vmatpush.msrb.mxu0 %v85_v16 }
  0x30   :  { %326 = vmatpush.msra.mxu1 %v85_v16  ;;  %328 = vset.pattern.permute.xlu0 %v329_v18 }
  0x31   :  { %295 = vperm.xlu0 %328, %v291_v17  }
  0x32   :  { %212 = vmatmul.f32.gmra.mxu1 %v16_v14 }
  0x34   :  { %319 = vmatmul.msk.f32.vlgmr.msrb.gmra.mxu0 %vm94_vm0, %v498_v44 }
  0x35   :  { %315 = vmatmul.msk.f32.vlgmr.msrb.gmra.mxu2 %vm94_vm0, %v498_v44 }
  0x37   :  { %258 = vmatmul.f32.gmra.mxu3 %v16_v14 }
  0x39   :  { %300 = vperm.xlu0 %328, %v292_v11  }
  0x3a   :  { %320 = vmatmul.msk.f32.vlgmr.msra.gmra.mxu1 %vm94_vm0, %v434_v24 }
  0x91   :  { %v190_v20 = vpop.f32.mrf.mxu3 }
  0x95   :  { %v141_v19 = vpop.f32.mrf.mxu1 }
  0x9e   :  { %v144_v21 = vpop.f32.mrf.mxu1 }
  0xa1   :  { %v118_v22 = vpop.f32.mrf.mxu0  ;;  %v233_v23 = vpop.f32.mrf.mxu3 }
  0xa2   :  { %v142_v37 = vadd.f32 %v141_v19, %v118_v22 }
  0xa3   :  { %v296_v33 = vpop.permute.xlu0 %295 }
  0xa7   :  { %v210_v25 = vpop.f32.mrf.mxu1 }
  0xa8   :  { %v164_v26 = vpop.f32.mrf.mxu2  ;;  %v234_v38 = vadd.f32 %v233_v23, %v210_v25 }
  0xa9   :  { %v121_v27 = vpop.f32.mrf.mxu0 }
  0xaa   :  { %v236_v28 = vpop.f32.mrf.mxu3  ;;  %v145_v40 = vadd.f32 %v144_v21, %v121_v27 }
  0xab   :  { %v301_v51 = vpop.permute.xlu0 %300 }
  0xaf   :  { %v213_v29 = vpop.f32.mrf.mxu1 }
  0xb0   :  { %v167_v30 = vpop.f32.mrf.mxu2  ;;  %v237_v42 = vadd.f32 %v236_v28, %v213_v29 }
  0xb1   :  { %v279_v32 = vpop.f32.mrf.mxu0  ;;  %v191_v24 = vadd.f32 %v190_v20, %v167_v30 }
  0xb2   :  { %v256_v31 = vpop.f32.mrf.mxu3 }
  0xb3   :  { %v280_v34 = vadd.f32 %v279_v32, %v256_v31  ;;  %v286_v46 = vmax.f32 %v145_v40, %v191_v24 }
  0xb5   :  { %v287_v43 = vmax.f32 %v234_v38, %v280_v34 }
  0xb7   :  { %v282_v36 = vpop.f32.mrf.mxu1 }
  0xb8   :  { %v187_v35 = vpop.f32.mrf.mxu2 }
  0xb9   :  { %v188_v39 = vadd.f32 %v187_v35, %v164_v26 }
  0xba   :  { %v259_v41 = vpop.f32.mrf.mxu3 }
  0xbb   :  { %v285_v44 = vmax.f32 %v142_v37, %v188_v39  ;;  %v283_v45 = vadd.f32 %v282_v36, %v259_v41 }
  0xbd   :  { %v289_v47 = vmax.f32 %v285_v44, %v287_v43  ;;  %v288_v48 = vmax.f32 %v237_v42, %v283_v45 }
  0xbf   :  { %v303_v49 = vadd.f32 %v296_v33, %v289_v47  ;;  %v290_v50 = vmax.f32 %v286_v46, %v288_v48 }
  0xc1   :  { %v305_v52 = vmax.f32 %v303_v49, 0.0  ;;  %v304_v53 = vadd.f32 %v301_v51, %v290_v50 }
  0xc3   :  { %307 = vst [vmem:[%s637_s3] sm:$0xff] %v305_v52  ;;  %v306_v54 = vmax.f32 %v304_v53, 0.0 }
  0xc5   :  { %308 = vst [vmem:[%s637_s3 + $0x8] sm:$0xff] %v306_v54 }

// kernel: convnet_forward.5
= control target key start
LH: loop header
LB: loop body
LE: loop exit
PB: predicated region body
PF: predicated region fallthrough
CT: control target
= control target key end

     0   :  { %v798_v3 = vmov 0   ;;  %vm226_vm0 = vcmask 130048   ;;  %vm612_vm1 = vcmask 982016   ;;  %vm728_vm2 = vcmask 1043456   ;;  %s1378_s0 = inlined_call_operand.vmem [shape: f32[400,128], index: 0, kind: input, shape index: {}]   ;;  %s1379_s2 = inlined_call_operand.vmem [shape: f32[120,1], index: 2, kind: input, shape index: {}]   ;;  %s1380_s1 = inlined_call_operand.vmem [shape: f32[120,400], index: 1, kind: input, shape index: {}]   ;;  %s1381_s4 = inlined_call_operand.vmem [shape: f32[84,1], index: 4, kind: input, shape index: {}]   ;;  %s1382_s6 = inlined_call_operand.vmem [shape: f32[16,1], index: 6, kind: input, shape index: {}]   ;;  %s1383_s3 = inlined_call_operand.vmem [shape: f32[84,120], index: 3, kind: input, shape index: {}]   ;;  %s1384_s5 = inlined_call_operand.vmem [shape: f32[16,84], index: 5, kind: input, shape index: {}]   ;;  %s1385_s7 = inlined_call_operand.vmem [shape: f32[16,128], index: 7, kind: output, shape index: {}]  }
   0x1   :  { %v101_v0 = vld [vmem:[%s1378_s0 + $0x78] sm:$0xff]  ;;  %796 = vset.pattern.permute.xlu1 %v798_v3  ;;  %795 = vset.pattern.permute.xlu0 %v798_v3  ;;  %v100_v4 = vld [vmem:[%s1378_s0 + $0x70] sm:$0xff]  ;;  %v99_v7 = vld [vmem:[%s1378_s0 + $0x68] sm:$0xff]  ;;  %vm721_vm3 = vcmask 687104  }
   0x2   :  { %v117_v1 = vld [vmem:[%s1378_s0 + $0xf8] sm:$0xff]  ;;  %272 = vmatpush.msra.mxu0 %v101_v0  ;;  %v116_v5 = vld [vmem:[%s1378_s0 + $0xf0] sm:$0xff]  ;;  %v115_v8 = vld [vmem:[%s1378_s0 + $0xe8] sm:$0xff]  ;;  %797 = vset.pattern.permute.xlu2 %v798_v3 }
   0x3   :  { %v133_v2 = vld [vmem:[%s1378_s0 + $0x178] sm:$0xff]  ;;  %334 = vmatpush.msra.mxu1 %v117_v1  ;;  %v132_v6 = vld [vmem:[%s1378_s0 + $0x170] sm:$0xff]  ;;  %v131_v9 = vld [vmem:[%s1378_s0 + $0x168] sm:$0xff] }
   0x4   :  { %396 = vmatpush.msra.mxu2 %v133_v2  ;;  %273 = vmatpush.msra.mxu0 %v100_v4  ;;  %v98_v10 = vld [vmem:[%s1378_s0 + $0x60] sm:$0xff]  ;;  %v97_v13 = vld [vmem:[%s1378_s0 + $0x58] sm:$0xff]  ;;  %v96_v16 = vld [vmem:[%s1378_s0 + $0x50] sm:$0xff] }
   0x5   :  { %335 = vmatpush.msra.mxu1 %v116_v5  ;;  %v114_v11 = vld [vmem:[%s1378_s0 + $0xe0] sm:$0xff]  ;;  %v113_v14 = vld [vmem:[%s1378_s0 + $0xd8] sm:$0xff]  ;;  %v112_v17 = vld [vmem:[%s1378_s0 + $0xd0] sm:$0xff] }
   0x6   :  { %397 = vmatpush.msra.mxu2 %v132_v6  ;;  %274 = vmatpush.msra.mxu0 %v99_v7  ;;  %v130_v12 = vld [vmem:[%s1378_s0 + $0x160] sm:$0xff]  ;;  %v129_v15 = vld [vmem:[%s1378_s0 + $0x158] sm:$0xff]  ;;  %v128_v18 = vld [vmem:[%s1378_s0 + $0x150] sm:$0xff] }
   0x7   :  { %336 = vmatpush.msra.mxu1 %v115_v8  ;;  %v95_v19 = vld [vmem:[%s1378_s0 + $0x48] sm:$0xff]  ;;  %v148_v21 = vld [vmem:[%s1379_s2 + $0x60] sm:$0xff]  ;;  %v93_v26 = vld [vmem:[%s1378_s0 + $0x38] sm:$0xff] }
   0x8   :  { %398 = vmatpush.msra.mxu2 %v131_v9  ;;  %275 = vmatpush.msra.mxu0 %v98_v10  ;;  %v111_v20 = vld [vmem:[%s1378_s0 + $0xc8] sm:$0xff]  ;;  %v94_v23 = vld [vmem:[%s1378_s0 + $0x40] sm:$0xff]  ;;  %v109_v27 = vld [vmem:[%s1378_s0 + $0xb8] sm:$0xff] }
   0x9   :  { %337 = vmatpush.msra.mxu1 %v114_v11  ;;  %v127_v22 = vld [vmem:[%s1378_s0 + $0x148] sm:$0xff]  ;;  %v110_v24 = vld [vmem:[%s1378_s0 + $0xc0] sm:$0xff]  ;;  %213 = vperm.xlu1 %796, %v148_v21   ;;  %v150_v28 = vld [vmem:[%s1379_s2 + $0x70] sm:$0xff] }
   0xa   :  { %399 = vmatpush.msra.mxu2 %v130_v12  ;;  %276 = vmatpush.msra.mxu0 %v97_v13  ;;  %v126_v25 = vld [vmem:[%s1378_s0 + $0x140] sm:$0xff]  ;;  %v125_v29 = vld [vmem:[%s1378_s0 + $0x138] sm:$0xff]  ;;  %v92_v30 = vld [vmem:[%s1378_s0 + $0x30] sm:$0xff] }
   0xb   :  { %338 = vmatpush.msra.mxu1 %v113_v14  ;;  %v108_v31 = vld [vmem:[%s1378_s0 + $0xb0] sm:$0xff]  ;;  %223 = vperm.xlu0 %795, %v150_v28   ;;  %v147_v33 = vld [vmem:[%s1379_s2 + $0x58] sm:$0xff]  ;;  %v91_v34 = vld [vmem:[%s1378_s0 + $0x28] sm:$0xff] }
   0xc   :  { %400 = vmatpush.msra.mxu2 %v129_v15  ;;  %277 = vmatpush.msra.mxu0 %v96_v16  ;;  %v124_v32 = vld [vmem:[%s1378_s0 + $0x130] sm:$0xff]  ;;  %v107_v35 = vld [vmem:[%s1378_s0 + $0xa8] sm:$0xff]  ;;  %v90_v38 = vld [vmem:[%s1378_s0 + $0x20] sm:$0xff] }
   0xd   :  { %339 = vmatpush.msra.mxu1 %v112_v17  ;;  %v123_v36 = vld [vmem:[%s1378_s0 + $0x128] sm:$0xff]  ;;  %v146_v37 = vld [vmem:[%s1379_s2 + $0x50] sm:$0xff]  ;;  %v106_v39 = vld [vmem:[%s1378_s0 + $0xa0] sm:$0xff] }
   0xe   :  { %401 = vmatpush.msra.mxu2 %v128_v18  ;;  %278 = vmatpush.msra.mxu0 %v95_v19  ;;  %v122_v40 = vld [vmem:[%s1378_s0 + $0x120] sm:$0xff]  ;;  %v149_v41 = vld [vmem:[%s1379_s2 + $0x68] sm:$0xff]  ;;  %v89_v42 = vld [vmem:[%s1378_s0 + $0x18] sm:$0xff] }
   0xf   :  { %340 = vmatpush.msra.mxu1 %v111_v20  ;;  %v105_v43 = vld [vmem:[%s1378_s0 + $0x98] sm:$0xff]  ;;  %203 = vperm.xlu2 %797, %v146_v37   ;;  %v88_v45 = vld [vmem:[%s1378_s0 + $0x10] sm:$0xff]  ;;  %v87_v49 = vld [vmem:[%s1378_s0 + $0x8] sm:$0xff] }
  0x10   :  { %402 = vmatpush.msra.mxu2 %v127_v22  ;;  %279 = vmatpush.msra.mxu0 %v94_v23  ;;  %v121_v44 = vld [vmem:[%s1378_s0 + $0x118] sm:$0xff]  ;;  %v104_v46 = vld [vmem:[%s1378_s0 + $0x90] sm:$0xff]  ;;  %v103_v50 = vld [vmem:[%s1378_s0 + $0x88] sm:$0xff] }
  0x11   :  { %341 = vmatpush.msra.mxu1 %v110_v24  ;;  %208 = vperm.xlu1 %796, %v147_v33   ;;  %v120_v47 = vld [vmem:[%s1378_s0 + $0x110] sm:$0xff]  ;;  %v143_v48 = vld [vmem:[%s1379_s2 + $0x38] sm:$0xff]  ;;  %v119_v51 = vld [vmem:[%s1378_s0 + $0x108] sm:$0xff] }
  0x12   :  { %403 = vmatpush.msra.mxu2 %v126_v25  ;;  %280 = vmatpush.msra.mxu0 %v93_v26  ;;  %v145_v52 = vld [vmem:[%s1379_s2 + $0x48] sm:$0xff]  ;;  %v86_v53 = vld [vmem:[%s1378_s0] sm:$0xff]  ;;  %v28_v58 = vld [vmem:[%s1380_s1 + $0x10] sm:$0xff] }
  0x13   :  { %342 = vmatpush.msra.mxu1 %v109_v27  ;;  %218 = vperm.xlu0 %795, %v149_v41   ;;  %v102_v54 = vld [vmem:[%s1378_s0 + $0x80] sm:$0xff]  ;;  %v27_v57 = vld [vmem:[%s1380_s1 + $0x8] sm:$0xff]  ;;  %v142_v62 = vld [vmem:[%s1379_s2 + $0x30] sm:$0xff] }
  0x14   :  { %404 = vmatpush.msra.mxu2 %v125_v29  ;;  %281 = vmatpush.msra.mxu0 %v92_v30  ;;  %v118_v55 = vld [vmem:[%s1378_s0 + $0x100] sm:$0xff]  ;;  %v135_v61 = vld [vmem:[%s1378_s0 + $0x188] sm:$0xff]  ;;  %v32_v1 = vld [vmem:[%s1380_s1 + $0x30] sm:$0xff] }
  0x15   :  { %343 = vmatpush.msra.mxu1 %v108_v31  ;;  %v26_v56 = vld [vmem:[%s1380_s1] sm:$0xff]  ;;  %791 = vmatpush.msra.mxu3 %v135_v61  ;;  %v31_v0 = vld [vmem:[%s1380_s1 + $0x28] sm:$0xff]  ;;  %v49_v5 = vld [vmem:[%s1380_s1 + $0xb8] sm:$0xff] }
  0x16   :  { %405 = vmatpush.msra.mxu2 %v124_v32  ;;  %282 = vmatpush.msra.mxu0 %v91_v34  ;;  %v144_v59 = vld [vmem:[%s1379_s2 + $0x40] sm:$0xff]  ;;  %v141_v2 = vld [vmem:[%s1379_s2 + $0x28] sm:$0xff]  ;;  %v139_v6 = vld [vmem:[%s1379_s2 + $0x18] sm:$0xff] }
  0x17   :  { %344 = vmatpush.msra.mxu1 %v107_v35  ;;  %198 = vperm.xlu2 %797, %v145_v52   ;;  %v140_v60 = vld [vmem:[%s1379_s2 + $0x20] sm:$0xff]  ;;  %v137_v3 = vld [vmem:[%s1379_s2 + $0x8] sm:$0xff]  ;;  %v36_v9 = vld [vmem:[%s1380_s1 + $0x50] sm:$0xff] }
  0x18   :  { %406 = vmatpush.msra.mxu2 %v123_v36  ;;  %283 = vmatpush.msra.mxu0 %v90_v38  ;;  %v30_v63 = vld [vmem:[%s1380_s1 + $0x20] sm:$0xff]  ;;  %v35_v8 = vld [vmem:[%s1380_s1 + $0x48] sm:$0xff]  ;;  %v138_v10 = vld [vmem:[%s1379_s2 + $0x10] sm:$0xff] }
  0x19   :  { %345 = vmatpush.msra.mxu1 %v106_v39  ;;  %188 = vperm.xlu1 %796, %v143_v48   ;;  %v134_v4 = vld [vmem:[%s1378_s0 + $0x180] sm:$0xff]  ;;  %v53_v11 = vld [vmem:[%s1380_s1 + $0xd8] sm:$0xff]  ;;  %v39_v14 = vld [vmem:[%s1380_s1 + $0x68] sm:$0xff] }
  0x1a   :  { %407 = vmatpush.msra.mxu2 %v122_v40  ;;  %284 = vmatpush.msra.mxu0 %v89_v42  ;;  %v34_v7 = vld [vmem:[%s1380_s1 + $0x40] sm:$0xff]  ;;  %v40_v15 = vld [vmem:[%s1380_s1 + $0x70] sm:$0xff]  ;;  %v57_v16 = vld [vmem:[%s1380_s1 + $0xf8] sm:$0xff] }
  0x1b   :  { %346 = vmatpush.msra.mxu1 %v105_v43  ;;  %193 = vperm.xlu0 %795, %v144_v59   ;;  %v136_v12 = vld [vmem:[%s1379_s2] sm:$0xff]  ;;  %v43_v18 = vld [vmem:[%s1380_s1 + $0x88] sm:$0xff]  ;;  %v44_v19 = vld [vmem:[%s1380_s1 + $0x90] sm:$0xff] }
  0x1c   :  { %408 = vmatpush.msra.mxu2 %v121_v44  ;;  %285 = vmatpush.msra.mxu0 %v88_v45  ;;  %v38_v13 = vld [vmem:[%s1380_s1 + $0x60] sm:$0xff]  ;;  %v61_v20 = vld [vmem:[%s1380_s1 + $0x118] sm:$0xff]  ;;  %v47_v22 = vld [vmem:[%s1380_s1 + $0xa8] sm:$0xff] }
  0x1d   :  { %347 = vmatpush.msra.mxu1 %v104_v46  ;;  %793 = vmatpush.msra.mxu3 %v134_v4  ;;  %v42_v17 = vld [vmem:[%s1380_s1 + $0x80] sm:$0xff]  ;;  %v48_v23 = vld [vmem:[%s1380_s1 + $0xb0] sm:$0xff]  ;;  %v65_v24 = vld [vmem:[%s1380_s1 + $0x138] sm:$0xff] }
  0x1e   :  { %409 = vmatpush.msra.mxu2 %v120_v47  ;;  %286 = vmatpush.msra.mxu0 %v87_v49  ;;  %v46_v21 = vld [vmem:[%s1380_s1 + $0xa0] sm:$0xff]  ;;  %v51_v26 = vld [vmem:[%s1380_s1 + $0xc8] sm:$0xff]  ;;  %v52_v27 = vld [vmem:[%s1380_s1 + $0xd0] sm:$0xff] }
  0x1f   :  { %348 = vmatpush.msra.mxu1 %v103_v50  ;;  %183 = vperm.xlu2 %797, %v142_v62   ;;  %v50_v25 = vld [vmem:[%s1380_s1 + $0xc0] sm:$0xff]  ;;  %v69_v28 = vld [vmem:[%s1380_s1 + $0x158] sm:$0xff]  ;;  %v556_v29 = vld [vmem:[%s1381_s4 + $0x50] sm:$0xf] }
  0x20   :  { %410 = vmatpush.msra.mxu2 %v119_v51  ;;  %287 = vmatpush.msra.mxu0 %v86_v53  ;;  %v54_v30 = vld [vmem:[%s1380_s1 + $0xe0] sm:$0xff]  ;;  %v55_v31 = vld [vmem:[%s1380_s1 + $0xe8] sm:$0xff]  ;;  %v56_v32 = vld [vmem:[%s1380_s1 + $0xf0] sm:$0xff] }
  0x21   :  { %349 = vmatpush.msra.mxu1 %v102_v54  ;;  %288 = vmatmul.f32.vlgmr.msra.gmra.mxu0 %v26_v56  ;;  %v73_v33 = vld [vmem:[%s1380_s1 + $0x178] sm:$0xff]  ;;  %v555_v35 = vld [vmem:[%s1381_s4 + $0x48] sm:$0xff]  ;;  %v58_v36 = vld [vmem:[%s1380_s1 + $0x100] sm:$0xff] }
  0x22   :  { %411 = vmatpush.msra.mxu2 %v118_v55  ;;  %350 = vmatmul.f32.vlgmr.msra.gmra.mxu1 %v27_v57  ;;  %v553_v34 = vld [vmem:[%s1381_s4 + $0x38] sm:$0xff]  ;;  %v59_v37 = vld [vmem:[%s1380_s1 + $0x108] sm:$0xff]  ;;  %v60_v38 = vld [vmem:[%s1380_s1 + $0x110] sm:$0xff] }
  0x23   :  { %412 = vmatmul.f32.vlgmr.msra.gmra.mxu2 %v28_v58  ;;  %472 = vmatpush.msrb.mxu1 %v135_v61  ;;  %v77_v39 = vld [vmem:[%s1380_s1 + $0x198] sm:$0xff]  ;;  %v550_v40 = vld [vmem:[%s1381_s4 + $0x20] sm:$0xff]  ;;  %v552_v41 = vld [vmem:[%s1381_s4 + $0x30] sm:$0xff] }
  0x24   :  { %790 = vmatpush.msrb.mxu2 %v135_v61  ;;  %173 = vperm.xlu1 %796, %v140_v60   ;;  %v62_v42 = vld [vmem:[%s1380_s1 + $0x120] sm:$0xff]  ;;  %v63_v43 = vld [vmem:[%s1380_s1 + $0x128] sm:$0xff]  ;;  %v64_v44 = vld [vmem:[%s1380_s1 + $0x130] sm:$0xff] }
  0x25   :  { %178 = vperm.xlu0 %795, %v141_v2   ;;  %766 = vmatmul.msk.f32.vlgmr.msra.gmra.mxu3 %vm226_vm0, %v49_v5  ;;  %v81_v45 = vld [vmem:[%s1380_s1 + $0x1b8] sm:$0xff]  ;;  %v547_v46 = vld [vmem:[%s1381_s4 + $0x8] sm:$0xff]  ;;  %v66_v48 = vld [vmem:[%s1380_s1 + $0x140] sm:$0xff] }
  0x26   :  { %473 = vmatpush.msrb.mxu1 %v134_v4  ;;  %792 = vmatpush.msrb.mxu2 %v134_v4  ;;  %v549_v47 = vld [vmem:[%s1381_s4 + $0x18] sm:$0xff]  ;;  %v67_v49 = vld [vmem:[%s1380_s1 + $0x148] sm:$0xff]  ;;  %v68_v50 = vld [vmem:[%s1380_s1 + $0x150] sm:$0xff] }
  0x27   :  { %168 = vperm.xlu2 %797, %v139_v6   ;;  %v85_v51 = vld [vmem:[%s1380_s1 + $0x1d8] sm:$0xff]  ;;  %v710_v52 = vld [vmem:[%s1382_s6 + $0x8] sm:$0xff]  ;;  %v546_v53 = vld [vmem:[%s1381_s4] sm:$0xff] }
  0x28   :  { %v70_v55 = vld [vmem:[%s1380_s1 + $0x160] sm:$0xff]  ;;  %v71_v56 = vld [vmem:[%s1380_s1 + $0x168] sm:$0xff]  ;;  %v72_v57 = vld [vmem:[%s1380_s1 + $0x170] sm:$0xff] }
  0x29   :  { %291 = vmatmul.f32.gmra.mxu0 %v30_v63  ;;  %v554_v58 = vld [vmem:[%s1381_s4 + $0x40] sm:$0xff]  ;;  %v75_v61 = vld [vmem:[%s1380_s1 + $0x188] sm:$0xff]  ;;  %v76_v62 = vld [vmem:[%s1380_s1 + $0x190] sm:$0xff] }
  0x2a   :  { %353 = vmatmul.f32.gmra.mxu1 %v31_v0  ;;  %v74_v59 = vld [vmem:[%s1380_s1 + $0x180] sm:$0xff]  ;;  %v551_v0 = vld [vmem:[%s1381_s4 + $0x28] sm:$0xff]  ;;  %v80_v4 = vld [vmem:[%s1380_s1 + $0x1b0] sm:$0xff] }
  0x2b   :  { %415 = vmatmul.f32.gmra.mxu2 %v32_v1  ;;  %v78_v2 = vld [vmem:[%s1380_s1 + $0x1a0] sm:$0xff] }
  0x2c   :  { %158 = vperm.xlu1 %796, %v137_v3   ;;  %v79_v3 = vld [vmem:[%s1380_s1 + $0x1a8] sm:$0xff] }
  0x2d   :  { %163 = vperm.xlu0 %795, %v138_v10   ;;  %767 = vmatmul.msk.f32.gmra.mxu3 %vm226_vm0, %v53_v11  ;;  %v83_v10 = vld [vmem:[%s1380_s1 + $0x1c8] sm:$0xff]  ;;  %v84_v11 = vld [vmem:[%s1380_s1 + $0x1d0] sm:$0xff] }
  0x2f   :  { %153 = vperm.xlu2 %797, %v136_v12  }
  0x31   :  { %294 = vmatmul.f32.gmra.mxu0 %v34_v7  ;;  %v548_v7 = vld [vmem:[%s1381_s4 + $0x10] sm:$0xff] }
  0x32   :  { %356 = vmatmul.f32.gmra.mxu1 %v35_v8  ;;  %v82_v8 = vld [vmem:[%s1380_s1 + $0x1c0] sm:$0xff] }
  0x33   :  { %418 = vmatmul.f32.gmra.mxu2 %v36_v9 }
  0x34   :  { %604 = vperm.xlu1 %796, %v555_v35  }
  0x35   :  { %768 = vmatmul.msk.f32.gmra.mxu3 %vm226_vm0, %v57_v16  ;;  %609 = vperm.xlu0 %795, %v556_v29   ;;  %v41_v16 = vld [vmem:[%s1380_s1 + $0x78] sm:$0xff] }
  0x37   :  { %599 = vperm.xlu2 %797, %v554_v58  }
  0x39   :  { %297 = vmatmul.f32.gmra.mxu0 %v38_v13  ;;  %v709_v13 = vld [vmem:[%s1382_s6] sm:$0xff] }
  0x3a   :  { %359 = vmatmul.f32.gmra.mxu1 %v39_v14 }
  0x3b   :  { %421 = vmatmul.f32.gmra.mxu2 %v40_v15  ;;  %v29_v15 = vld [vmem:[%s1380_s1 + $0x18] sm:$0xff] }
  0x3c   :  { %589 = vperm.xlu1 %796, %v552_v41  }
  0x3d   :  { %769 = vmatmul.msk.f32.gmra.mxu3 %vm226_vm0, %v61_v20  ;;  %594 = vperm.xlu0 %795, %v553_v34  }
  0x3f   :  { %584 = vperm.xlu2 %797, %v551_v0  }
  0x41   :  { %300 = vmatmul.f32.gmra.mxu0 %v42_v17 }
  0x42   :  { %362 = vmatmul.f32.gmra.mxu1 %v43_v18 }
  0x43   :  { %424 = vmatmul.f32.gmra.mxu2 %v44_v19 }
  0x44   :  { %574 = vperm.xlu1 %796, %v549_v47  }
  0x45   :  { %770 = vmatmul.msk.f32.gmra.mxu3 %vm226_vm0, %v65_v24  ;;  %579 = vperm.xlu0 %795, %v550_v40   ;;  %v45_v24 = vld [vmem:[%s1380_s1 + $0x98] sm:$0xff] }
  0x47   :  { %569 = vperm.xlu2 %797, %v548_v7  }
  0x49   :  { %303 = vmatmul.f32.gmra.mxu0 %v46_v21 }
  0x4a   :  { %365 = vmatmul.f32.gmra.mxu1 %v47_v22 }
  0x4b   :  { %427 = vmatmul.f32.gmra.mxu2 %v48_v23  ;;  %v33_v23 = vld [vmem:[%s1380_s1 + $0x38] sm:$0xff] }
  0x4c   :  { %559 = vperm.xlu1 %796, %v546_v53  }
  0x4d   :  { %771 = vmatmul.msk.f32.gmra.mxu3 %vm226_vm0, %v69_v28  ;;  %564 = vperm.xlu0 %795, %v547_v46  }
  0x4f   :  { %713 = vperm.xlu2 %797, %v709_v13  }
  0x51   :  { %306 = vmatmul.f32.gmra.mxu0 %v50_v25 }
  0x52   :  { %368 = vmatmul.f32.gmra.mxu1 %v51_v26 }
  0x53   :  { %430 = vmatmul.f32.gmra.mxu2 %v52_v27 }
  0x55   :  { %772 = vmatmul.msk.f32.gmra.mxu3 %vm226_vm0, %v73_v33  ;;  %718 = vperm.xlu0 %795, %v710_v52   ;;  %v37_v33 = vld [vmem:[%s1380_s1 + $0x58] sm:$0xff] }
  0x59   :  { %309 = vmatmul.f32.gmra.mxu0 %v54_v30 }
  0x5a   :  { %371 = vmatmul.f32.gmra.mxu1 %v55_v31 }
  0x5b   :  { %433 = vmatmul.f32.gmra.mxu2 %v56_v32 }
  0x5d   :  { %773 = vmatmul.msk.f32.gmra.mxu3 %vm226_vm0, %v77_v39 }
  0x61   :  { %312 = vmatmul.f32.gmra.mxu0 %v58_v36 }
  0x62   :  { %374 = vmatmul.f32.gmra.mxu1 %v59_v37 }
  0x63   :  { %436 = vmatmul.f32.gmra.mxu2 %v60_v38 }
  0x65   :  { %774 = vmatmul.msk.f32.gmra.mxu3 %vm226_vm0, %v81_v45 }
  0x69   :  { %315 = vmatmul.f32.gmra.mxu0 %v62_v42  ;;  %v1199_v54 = vpop.permute.xlu2 %203 }
  0x6a   :  { %377 = vmatmul.f32.gmra.mxu1 %v63_v43 }
  0x6b   :  { %439 = vmatmul.f32.gmra.mxu2 %v64_v44 }
  0x6d   :  { %775 = vmatmul.msk.f32.gmra.mxu3 %vm226_vm0, %v85_v51 }
  0x71   :  { %318 = vmatmul.f32.gmra.mxu0 %v66_v48  ;;  %v1217_v60 = vpop.permute.xlu2 %198 }
  0x72   :  { %380 = vmatmul.f32.gmra.mxu1 %v67_v49 }
  0x73   :  { %442 = vmatmul.f32.gmra.mxu2 %v68_v50 }
  0x79   :  { %321 = vmatmul.f32.gmra.mxu0 %v70_v55  ;;  %v1243_v6 = vpop.permute.xlu2 %183 }
  0x7a   :  { %383 = vmatmul.f32.gmra.mxu1 %v71_v56 }
  0x7b   :  { %445 = vmatmul.f32.gmra.mxu2 %v72_v57  ;;  %v1225_v63 = vpop.permute.xlu1 %213 }
  0x7d   :  { %v1230_v1 = vpop.permute.xlu0 %223 }
  0x81   :  { %324 = vmatmul.f32.gmra.mxu0 %v74_v59  ;;  %v169_v14 = vpop.permute.xlu2 %168 }
  0x82   :  { %386 = vmatmul.f32.gmra.mxu1 %v75_v61 }
  0x83   :  { %448 = vmatmul.f32.gmra.mxu2 %v76_v62  ;;  %v1241_v5 = vpop.permute.xlu1 %208 }
  0x85   :  { %v1251_v9 = vpop.permute.xlu0 %218 }
  0x89   :  { %327 = vmatmul.f32.gmra.mxu0 %v78_v2  ;;  %v154_v19 = vpop.permute.xlu2 %153 }
  0x8a   :  { %389 = vmatmul.f32.gmra.mxu1 %v79_v3 }
  0x8b   :  { %451 = vmatmul.f32.gmra.mxu2 %v80_v4  ;;  %v1259_v12 = vpop.permute.xlu1 %188 }
  0x8d   :  { %v1270_v17 = vpop.permute.xlu0 %193 }
  0x91   :  { %330 = vmatmul.f32.gmra.mxu0 %v82_v8 }
  0x92   :  { %392 = vmatmul.f32.gmra.mxu1 %v83_v10 }
  0x93   :  { %454 = vmatmul.f32.gmra.mxu2 %v84_v11 }
  0x96   :  { %v174_v18 = vpop.permute.xlu1 %173 }
  0x97   :  { %v179_v26 = vpop.permute.xlu0 %178 }
  0x9a   :  { %761 = vmatmul.msk.f32.vlgmr.msrb.gmra.mxu1 %vm226_vm0, %v29_v15 }
  0x9b   :  { %764 = vmatmul.msk.f32.vlgmr.msrb.gmra.mxu2 %vm226_vm0, %v41_v16 }
  0x9e   :  { %v289_v20 = vpop.f32.mrf.mxu0  ;;  %v159_v27 = vpop.permute.xlu1 %158 }
  0x9f   :  { %v351_v21 = vpop.f32.mrf.mxu1  ;;  %v290_v22 = vadd.f32 %v289_v20, %v154_v19  ;;  %v164_v35 = vpop.permute.xlu0 %163 }
  0xa1   :  { %v352_v25 = vadd.f32 %v351_v21, %v290_v22 }
  0xa2   :  { %762 = vmatmul.msk.f32.gmra.mxu1 %vm226_vm0, %v33_v23 }
  0xa3   :  { %765 = vmatmul.msk.f32.gmra.mxu2 %vm226_vm0, %v45_v24 }
  0xa6   :  { %v413_v28 = vpop.f32.mrf.mxu2  ;;  %v292_v30 = vpop.f32.mrf.mxu0 }
  0xa7   :  { %v1282_v29 = vadd.f32 %v413_v28, %v352_v25  ;;  %v354_v31 = vpop.f32.mrf.mxu1  ;;  %v293_v32 = vadd.f32 %v292_v30, %v159_v27 }
  0xa8   :  { %v490_v48 = vpop.f32.mrf.mxu3 }
  0xa9   :  { %v355_v34 = vadd.f32 %v354_v31, %v293_v32 }
  0xaa   :  { %763 = vmatmul.msk.f32.gmra.mxu1 %vm226_vm0, %v37_v33 }
  0xae   :  { %v416_v36 = vpop.f32.mrf.mxu2  ;;  %v295_v38 = vpop.f32.mrf.mxu0 }
  0xaf   :  { %v1288_v37 = vadd.f32 %v416_v36, %v355_v34  ;;  %v357_v39 = vpop.f32.mrf.mxu1  ;;  %v296_v40 = vadd.f32 %v295_v38, %v164_v35 }
  0xb0   :  { %v493_v57 = vpop.f32.mrf.mxu3 }
  0xb1   :  { %v358_v41 = vadd.f32 %v357_v39, %v296_v40 }
  0xb6   :  { %v419_v42 = vpop.f32.mrf.mxu2  ;;  %v298_v44 = vpop.f32.mrf.mxu0 }
  0xb7   :  { %v1290_v43 = vadd.f32 %v419_v42, %v358_v41  ;;  %v299_v45 = vadd.f32 %v298_v44, %v169_v14  ;;  %v360_v46 = vpop.f32.mrf.mxu1 }
  0xb8   :  { %v496_v10 = vpop.f32.mrf.mxu3 }
  0xb9   :  { %v361_v47 = vadd.f32 %v360_v46, %v299_v45 }
  0xbe   :  { %v422_v49 = vpop.f32.mrf.mxu2  ;;  %v301_v51 = vpop.f32.mrf.mxu0 }
  0xbf   :  { %v1292_v50 = vadd.f32 %v422_v49, %v361_v47  ;;  %v302_v52 = vadd.f32 %v301_v51, %v174_v18  ;;  %v363_v53 = vpop.f32.mrf.mxu1 }
  0xc0   :  { %v1302_v22 = vpop.f32.mrf.mxu3 }
  0xc1   :  { %v364_v55 = vadd.f32 %v363_v53, %v302_v52 }
  0xc6   :  { %v425_v56 = vpop.f32.mrf.mxu2  ;;  %v304_v59 = vpop.f32.mrf.mxu0 }
  0xc7   :  { %v1294_v58 = vadd.f32 %v425_v56, %v364_v55  ;;  %v305_v61 = vadd.f32 %v304_v59, %v179_v26  ;;  %v366_v62 = vpop.f32.mrf.mxu1 }
  0xc8   :  { %v502_v27 = vpop.f32.mrf.mxu3 }
  0xc9   :  { %v367_v0 = vadd.f32 %v366_v62, %v305_v61 }
  0xce   :  { %v428_v2 = vpop.f32.mrf.mxu2  ;;  %v307_v4 = vpop.f32.mrf.mxu0 }
  0xcf   :  { %v429_v3 = vadd.f32 %v428_v2, %v367_v0  ;;  %v308_v7 = vadd.f32 %v307_v4, %v1243_v6  ;;  %v369_v8 = vpop.f32.mrf.mxu1 }
  0xd0   :  { %v505_v33 = vpop.f32.mrf.mxu3 }
  0xd1   :  { %v1297_v11 = vadd.f32 %v490_v48, %v429_v3  ;;  %v370_v13 = vadd.f32 %v369_v8, %v308_v7 }
  0xd6   :  { %v431_v14 = vpop.f32.mrf.mxu2  ;;  %v310_v16 = vpop.f32.mrf.mxu0 }
  0xd7   :  { %v432_v15 = vadd.f32 %v431_v14, %v370_v13  ;;  %v311_v18 = vadd.f32 %v310_v16, %v1259_v12  ;;  %v372_v19 = vpop.f32.mrf.mxu1 }
  0xd8   :  { %v508_v39 = vpop.f32.mrf.mxu3 }
  0xd9   :  { %v1300_v20 = vadd.f32 %v493_v57, %v432_v15  ;;  %v373_v21 = vadd.f32 %v372_v19, %v311_v18 }
  0xde   :  { %v434_v23 = vpop.f32.mrf.mxu2  ;;  %v313_v25 = vpop.f32.mrf.mxu0 }
  0xdf   :  { %v435_v24 = vadd.f32 %v434_v23, %v373_v21  ;;  %v375_v6 = vpop.f32.mrf.mxu1  ;;  %v314_v8 = vadd.f32 %v313_v25, %v1270_v17 }
  0xe0   :  { %v511_v44 = vpop.f32.mrf.mxu3 }
  0xe1   :  { %v1304_v26 = vadd.f32 %v496_v10, %v435_v24  ;;  %v376_v18 = vadd.f32 %v375_v6, %v314_v8 }
  0xe6   :  { %v437_v28 = vpop.f32.mrf.mxu2  ;;  %v316_v30 = vpop.f32.mrf.mxu0 }
  0xe7   :  { %v378_v31 = vpop.f32.mrf.mxu1  ;;  %v317_v0 = vadd.f32 %v316_v30, %v1217_v60 }
  0xe8   :  { %v514_v48 = vpop.f32.mrf.mxu3 }
  0xee   :  { %v440_v32 = vpop.f32.mrf.mxu2  ;;  %v319_v34 = vpop.f32.mrf.mxu0 }
  0xef   :  { %v381_v12 = vpop.f32.mrf.mxu1  ;;  %v320_v61 = vadd.f32 %v319_v34, %v1199_v54  ;;  %v438_v34 = vadd.f32 %v437_v28, %v376_v18  ;;  %v526_v28 = vmax.f32 %v1300_v20, 0.0 }
  0xf6   :  { %v443_v35 = vpop.f32.mrf.mxu2  ;;  %v322_v36 = vpop.f32.mrf.mxu0 }
  0xf7   :  { %v384_v38 = vpop.f32.mrf.mxu1  ;;  %v323_v56 = vadd.f32 %v322_v36, %v1241_v5  ;;  %v379_v5 = vadd.f32 %v378_v31, %v317_v0 }
  0xf9   :  { %v385_v2 = vadd.f32 %v384_v38, %v323_v56  ;;  %v441_v60 = vadd.f32 %v440_v32, %v379_v5  ;;  %v500_v38 = vadd.f32 %v1302_v22, %v438_v34 }
  0xfb   :  { %v503_v25 = vadd.f32 %v502_v27, %v441_v60 }
  0xfd   :  { %v529_v6 = vmax.f32 %v503_v25, 0.0 }
  0xfe   :  { %v446_v40 = vpop.f32.mrf.mxu2  ;;  %v325_v41 = vpop.f32.mrf.mxu0 }
  0xff   :  { %v387_v42 = vpop.f32.mrf.mxu1  ;;  %v326_v52 = vadd.f32 %v325_v41, %v1225_v63  ;;  %v382_v63 = vadd.f32 %v381_v12, %v320_v61  ;;  %v447_v15 = vadd.f32 %v446_v40, %v385_v2  ;;  %v525_v41 = vmax.f32 %v1297_v11, 0.0  ;;  %v539_v11 = vld [vmem:[%s1383_s3 + $0x20] sm:$0xff] }
 0x101   :  { %v388_v62 = vadd.f32 %v387_v42, %v326_v52  ;;  %v444_v54 = vadd.f32 %v443_v35, %v382_v63  ;;  %v509_v23 = vadd.f32 %v508_v39, %v447_v15  ;;  %v528_v35 = vmax.f32 %v500_v38, 0.0  ;;  %v543_v52 = vld [vmem:[%s1383_s3 + $0x40] sm:$0xff]  ;;  %v600_v63 = vpop.permute.xlu2 %599 }
 0x102   :  { %v527_v39 = vmax.f32 %v1304_v26, 0.0 }
 0x103   :  { %v506_v36 = vadd.f32 %v505_v33, %v444_v54  ;;  %v531_v12 = vmax.f32 %v509_v23, 0.0 }
 0x105   :  { %v530_v40 = vmax.f32 %v506_v36, 0.0 }
 0x106   :  { %v449_v45 = vpop.f32.mrf.mxu2  ;;  %v328_v46 = vpop.f32.mrf.mxu0 }
 0x107   :  { %v390_v47 = vpop.f32.mrf.mxu1  ;;  %v329_v49 = vadd.f32 %v328_v46, %v1251_v9  ;;  %v517_v9 = vpop.f32.mrf.mxu3  ;;  %v450_v10 = vadd.f32 %v449_v45, %v388_v62 }
 0x109   :  { %v391_v57 = vadd.f32 %v390_v47, %v329_v49  ;;  %v512_v19 = vadd.f32 %v511_v44, %v450_v10  ;;  %v541_v49 = vld [vmem:[%s1383_s3 + $0x30] sm:$0xff]  ;;  %v585_v18 = vpop.permute.xlu2 %584 }
 0x10b   :  { %v532_v17 = vmax.f32 %v512_v19, 0.0 }
 0x10e   :  { %v452_v51 = vpop.f32.mrf.mxu2  ;;  %v331_v53 = vpop.f32.mrf.mxu0 }
 0x10f   :  { %v393_v55 = vpop.f32.mrf.mxu1  ;;  %v332_v59 = vadd.f32 %v331_v53, %v1230_v1  ;;  %v453_v3 = vadd.f32 %v452_v51, %v391_v57  ;;  %v542_v51 = vld [vmem:[%s1383_s3 + $0x38] sm:$0xff]  ;;  %v544_v53 = vld [vmem:[%s1383_s3 + $0x48] sm:$0xff] }
 0x111   :  { %v394_v4 = vadd.f32 %v393_v55, %v332_v59  ;;  %v515_v16 = vadd.f32 %v514_v48, %v453_v3  ;;  %v540_v48 = vld [vmem:[%s1383_s3 + $0x28] sm:$0xff]  ;;  %v545_v55 = vld [vmem:[%s1383_s3 + $0x50] sm:$0xf] }
 0x113   :  { %v533_v24 = vmax.f32 %v515_v16, 0.0 }
 0x116   :  { %v455_v7 = vpop.f32.mrf.mxu2 }
 0x117   :  { %v456_v13 = vadd.f32 %v455_v7, %v394_v4  ;;  %v475_v14 = vpop.f32.mrf.mxu1  ;;  %v610_v7 = vpop.permute.xlu0 %609 }
 0x118   :  { %v476_v26 = vadd.f32 %v475_v14, %v1282_v29  ;;  %v537_v29 = vld [vmem:[%s1383_s3 + $0x10] sm:$0xff] }
 0x119   :  { %v518_v1 = vadd.f32 %v517_v9, %v456_v13  ;;  %v605_v9 = vpop.permute.xlu1 %604 }
 0x11a   :  { %v520_v47 = vmax.f32 %v476_v26, 0.0 }
 0x11b   :  { %v534_v21 = vmax.f32 %v518_v1, 0.0 }
 0x11d   :  { %647 = vmatpush.msrb.mxu3 %v534_v21 }
 0x11e   :  { %v484_v30 = vpop.f32.mrf.mxu2 }
 0x11f   :  { %648 = vmatpush.msrb.mxu3 %v533_v24  ;;  %v478_v31 = vpop.f32.mrf.mxu1  ;;  %v485_v22 = vadd.f32 %v484_v30, %v1292_v50  ;;  %v535_v50 = vld [vmem:[%s1383_s3] sm:$0xff]  ;;  %v595_v10 = vpop.permute.xlu0 %594 }
 0x120   :  { %v479_v46 = vadd.f32 %v478_v31, %v1288_v37  ;;  %v536_v37 = vld [vmem:[%s1383_s3 + $0x8] sm:$0xff]  ;;  %v570_v31 = vpop.permute.xlu2 %569 }
 0x121   :  { %649 = vmatpush.msrb.mxu3 %v532_v17  ;;  %v523_v45 = vmax.f32 %v485_v22, 0.0  ;;  %v590_v13 = vpop.permute.xlu1 %589  ;;  %v707_v22 = vld [vmem:[%s1384_s5] sm:$0xff] }
 0x123   :  { %650 = vmatpush.msrb.mxu3 %v531_v12 }
 0x125   :  { %651 = vmatpush.msrb.mxu3 %v530_v40 }
 0x126   :  { %v487_v32 = vpop.f32.mrf.mxu2 }
 0x127   :  { %652 = vmatpush.msrb.mxu3 %v529_v6  ;;  %v488_v33 = vadd.f32 %v487_v32, %v1294_v58  ;;  %v481_v27 = vpop.f32.mrf.mxu1  ;;  %v521_v58 = vmax.f32 %v479_v46, 0.0  ;;  %v580_v21 = vpop.permute.xlu0 %579 }
 0x128   :  { %v482_v44 = vadd.f32 %v481_v27, %v1290_v43  ;;  %v538_v43 = vld [vmem:[%s1383_s3 + $0x18] sm:$0xff] }
 0x129   :  { %653 = vmatpush.msrb.mxu3 %v528_v35  ;;  %v524_v42 = vmax.f32 %v488_v33, 0.0  ;;  %v575_v24 = vpop.permute.xlu1 %574 }
 0x12a   :  { %v522_v20 = vmax.f32 %v482_v44, 0.0  ;;  %v714_v44 = vpop.permute.xlu2 %713 }
 0x12b   :  { %654 = vmatpush.msrb.mxu3 %v527_v39 }
 0x12d   :  { %655 = vmatpush.msrb.mxu3 %v526_v28 }
 0x12f   :  { %656 = vmatpush.msrb.mxu3 %v525_v41  ;;  %v565_v6 = vpop.permute.xlu0 %564 }
 0x131   :  { %657 = vmatpush.msrb.mxu3 %v524_v42  ;;  %v560_v39 = vpop.permute.xlu1 %559  ;;  %v708_v42 = vld [vmem:[%s1384_s5 + $0x8] sm:$0xff] }
 0x133   :  { %658 = vmatpush.msrb.mxu3 %v523_v45 }
 0x135   :  { %659 = vmatpush.msrb.mxu3 %v522_v20 }
 0x137   :  { %660 = vmatpush.msrb.mxu3 %v521_v58  ;;  %v719_v26 = vpop.permute.xlu0 %718 }
 0x139   :  { %661 = vmatpush.msrb.mxu3 %v520_v47 }
 0x13a   :  { %776 = vmatmul.msk.f32.vlgmr.msrb.gmra.mxu3 %vm612_vm1, %v535_v50 }
 0x142   :  { %777 = vmatmul.msk.f32.gmra.mxu3 %vm612_vm1, %v536_v37 }
 0x14a   :  { %778 = vmatmul.msk.f32.gmra.mxu3 %vm612_vm1, %v537_v29 }
 0x152   :  { %779 = vmatmul.msk.f32.gmra.mxu3 %vm612_vm1, %v538_v43 }
 0x15a   :  { %780 = vmatmul.msk.f32.gmra.mxu3 %vm612_vm1, %v539_v11 }
 0x162   :  { %781 = vmatmul.msk.f32.gmra.mxu3 %vm612_vm1, %v540_v48 }
 0x16a   :  { %782 = vmatmul.msk.f32.gmra.mxu3 %vm612_vm1, %v541_v49 }
 0x172   :  { %783 = vmatmul.msk.f32.gmra.mxu3 %vm612_vm1, %v542_v51 }
 0x17a   :  { %784 = vmatmul.msk.f32.gmra.mxu3 %vm612_vm1, %v543_v52 }
 0x182   :  { %785 = vmatmul.msk.f32.gmra.mxu3 %vm612_vm1, %v544_v53 }
 0x18a   :  { %786 = vmatmul.msk.f32.gmra.mxu3 %vm612_vm1, %v545_v55 }
 0x1bd   :  { %v663_v56 = vpop.f32.mrf.mxu3 }
 0x1be   :  { %v664_v28 = vadd.f32 %v663_v56, %v560_v39 }
 0x1c0   :  { %v696_v41 = vmax.f32 %v664_v28, 0.0 }
 0x1c5   :  { %v666_v57 = vpop.f32.mrf.mxu3 }
 0x1c6   :  { %v667_v35 = vadd.f32 %v666_v57, %v565_v6 }
 0x1c8   :  { %v697_v27 = vmax.f32 %v667_v35, 0.0 }
 0x1cd   :  { %v669_v59 = vpop.f32.mrf.mxu3 }
 0x1ce   :  { %v670_v38 = vadd.f32 %v669_v59, %v570_v31 }
 0x1d0   :  { %v698_v33 = vmax.f32 %v670_v38, 0.0 }
 0x1d5   :  { %v672_v61 = vpop.f32.mrf.mxu3 }
 0x1d6   :  { %v673_v25 = vadd.f32 %v672_v61, %v575_v24 }
 0x1d8   :  { %v699_v32 = vmax.f32 %v673_v25, 0.0 }
 0x1dd   :  { %v675_v62 = vpop.f32.mrf.mxu3 }
 0x1de   :  { %v676_v36 = vadd.f32 %v675_v62, %v580_v21 }
 0x1e0   :  { %v700_v40 = vmax.f32 %v676_v36, 0.0 }
 0x1e5   :  { %v678_v0 = vpop.f32.mrf.mxu3 }
 0x1e6   :  { %v679_v30 = vadd.f32 %v678_v0, %v585_v18 }
 0x1e8   :  { %v701_v12 = vmax.f32 %v679_v30, 0.0 }
 0x1ed   :  { %v681_v2 = vpop.f32.mrf.mxu3 }
 0x1ee   :  { %v682_v60 = vadd.f32 %v681_v2, %v590_v13 }
 0x1f0   :  { %v702_v17 = vmax.f32 %v682_v60, 0.0 }
 0x1f5   :  { %v684_v3 = vpop.f32.mrf.mxu3 }
 0x1f6   :  { %v685_v54 = vadd.f32 %v684_v3, %v595_v10 }
 0x1f8   :  { %v703_v34 = vmax.f32 %v685_v54, 0.0 }
 0x1fd   :  { %v687_v4 = vpop.f32.mrf.mxu3 }
 0x1fe   :  { %v688_v16 = vadd.f32 %v687_v4, %v600_v63 }
 0x200   :  { %v704_v23 = vmax.f32 %v688_v16, 0.0 }
 0x205   :  { %v690_v8 = vpop.f32.mrf.mxu3 }
 0x206   :  { %v691_v5 = vadd.f32 %v690_v8, %v605_v9 }
 0x208   :  { %v705_v19 = vmax.f32 %v691_v5, 0.0 }
 0x20d   :  { %v693_v14 = vpop.f32.mrf.mxu3 }
 0x20e   :  { %v694_v15 = vadd.f32 %v693_v14, %v610_v7 }
 0x210   :  { %v706_v1 = vmax.f32 %v694_v15, 0.0 }
 0x212   :  { %787 = vmatpush.msk.msrb.mxu0 %vm728_vm2, %v706_v1 }
 0x214   :  { %738 = vmatpush.msrb.mxu0 %v705_v19 }
 0x216   :  { %739 = vmatpush.msrb.mxu0 %v704_v23 }
 0x218   :  { %740 = vmatpush.msrb.mxu0 %v703_v34 }
 0x21a   :  { %741 = vmatpush.msrb.mxu0 %v702_v17 }
 0x21c   :  { %742 = vmatpush.msrb.mxu0 %v701_v12 }
 0x21e   :  { %743 = vmatpush.msrb.mxu0 %v700_v40 }
 0x220   :  { %744 = vmatpush.msrb.mxu0 %v699_v32 }
 0x222   :  { %745 = vmatpush.msrb.mxu0 %v698_v33 }
 0x224   :  { %746 = vmatpush.msrb.mxu0 %v697_v27 }
 0x226   :  { %747 = vmatpush.msrb.mxu0 %v696_v41 }
 0x227   :  { %788 = vmatmul.msk.f32.vlgmr.msrb.gmra.mxu0 %vm721_vm3, %v707_v22 }
 0x22f   :  { %789 = vmatmul.msk.f32.gmra.mxu0 %vm721_vm3, %v708_v42 }
 0x2a4   :  { %v749_v45 = vpop.f32.mrf.mxu0 }
 0x2a5   :  { %v750_v46 = vadd.f32 %v749_v45, %v714_v44 }
 0x2a7   :  { %755 = vst [vmem:[%s1385_s7] sm:$0xff] %v750_v46 }
 0x2ac   :  { %v752_v20 = vpop.f32.mrf.mxu0 }
 0x2ad   :  { %v753_v58 = vadd.f32 %v752_v20, %v719_v26 }
 0x2af   :  { %756 = vst [vmem:[%s1385_s7 + $0x8] sm:$0xff] %v753_v58 }

</bundles_post_ra>
